<compile_context>
chip_gen: v7x
topology: tpu7x:2x2x1
jax: 0.10.0
libtpu: 0.0.40
codegen_flags: <defaults>
</compile_context>

<pallas_src>
import jax
import jax.numpy as jnp
from jax.experimental import pallas as pl
from jax.experimental.pallas import tpu as pltpu


def skill_policy_kernel(skill_ref, state_ref, w1s_ref, w1t_ref, b1_ref,
                        w2_ref, b2_ref, o_ref):
    # skill_ref: [TB, skill_dim]   state_ref: [TB, state_dim]
    # w1s_ref  : [skill_dim, hid]  w1t_ref  : [state_dim, hid]   b1_ref: [1, hid]
    # w2_ref   : [hid, out]        b2_ref   : [1, out]           o_ref : [TB, out]

    # Linear 1 with the concat fused:  cat(skill, state) @ W1
    #   == skill @ W1[:skill_dim] + state @ W1[skill_dim:]
    h = (jnp.dot(skill_ref[...], w1s_ref[...], preferred_element_type=jnp.float32)
         + jnp.dot(state_ref[...], w1t_ref[...], preferred_element_type=jnp.float32)
         + b1_ref[...])
    # LeakyReLU(0.1) on the VPU; Dropout(p=0) is the identity -> no-op.
    h = jnp.where(h > 0.0, h, 0.1 * h)

    # Linear 2 (MXU).
    logits = jnp.dot(h, w2_ref[...], preferred_element_type=jnp.float32) + b2_ref[...]

    # Numerically stable softmax along the last (lane) axis.
    m = jnp.max(logits, axis=-1, keepdims=True)
    e = jnp.exp(logits - m)
    denom = jnp.sum(e, axis=-1, keepdims=True)
    # Exact reciprocal (VALU-refined); keeps the 1e-5 allclose vs. the reference.
    o_ref[...] = e * pl.reciprocal(denom, approx=False)


def skill_policy_forward(skill_embedding, state_embedding, params, *,
                         max_block_b=4096):
    """Batched forward. Picks a tiling that never pads or slices the batch."""
    w1_skill, w1_state, b1, w2, b2 = params
    B, skill_dim = skill_embedding.shape
    state_dim = state_embedding.shape[1]
    hid_dim = w1_skill.shape[1]
    out_dim = w2.shape[1]

    # Tile selection:
    #  * B <= max_block_b  -> one full-batch block, grid=(1,). A block shape equal
    #    to the full array dims bypasses the (8,128) divisibility rule, so no pad.
    #  * B  > max_block_b  -> largest multiple-of-8 tile <= max_block_b that
    #    divides B exactly (no pad, no trailing slice).
    if B <= max_block_b:
        tb = B
    else:
        tb = None
        for cand in range(max_block_b - max_block_b % 8, 7, -8):
            if B % cand == 0:
                tb = cand
                break
        if tb is None:
            # No clean multiple-of-8 divisor: fall back to a single full-batch
            # block (correct; only a VMEM concern for enormous odd batches).
            # TODO(synk): for huge, oddly-sized B, pad the batch upstream instead.
            tb = B
    grid = (B // tb,)

    # Advisory cost estimate (tiny kernel: don't let XLA serialize around it).
    in_size = skill_dim + state_dim
    flops = 2 * B * (in_size * hid_dim + hid_dim * out_dim)
    transcendentals = B * out_dim  # exp in the softmax
    bytes_accessed = 4 * (B * (skill_dim + state_dim + out_dim)
                          + in_size * hid_dim + hid_dim
                          + hid_dim * out_dim + out_dim)

    return pl.pallas_call(
        skill_policy_kernel,
        out_shape=jax.ShapeDtypeStruct((B, out_dim), jnp.float32),
        grid=grid,
        in_specs=[
            # Activations: tiled along the batch axis.
            pl.BlockSpec((tb, skill_dim), lambda i: (i, 0)),
            pl.BlockSpec((tb, state_dim), lambda i: (i, 0)),
            # Weights / biases: constant index_map -> no re-DMA per grid step.
            pl.BlockSpec((skill_dim, hid_dim), lambda i: (0, 0)),
            pl.BlockSpec((state_dim, hid_dim), lambda i: (0, 0)),
            pl.BlockSpec((1, hid_dim), lambda i: (0, 0)),
            pl.BlockSpec((hid_dim, out_dim), lambda i: (0, 0)),
            pl.BlockSpec((1, out_dim), lambda i: (0, 0)),
        ],
        out_specs=pl.BlockSpec((tb, out_dim), lambda i: (i, 0)),
        compiler_params=pltpu.CompilerParams(
            dimension_semantics=("parallel",)),  # matters only for multi-step grids
        cost_estimate=pl.CostEstimate(
            flops=flops,
            transcendentals=transcendentals,
            bytes_accessed=bytes_accessed),
    )(skill_embedding, state_embedding, w1_skill, w1_state, b1, w2, b2)


def init_params(key, skill_dim, state_dim, hid_dim, out_dim):
    """Deterministic synthetic parameters; W1 is pre-split so the concat fuses away."""
    in_size = skill_dim + state_dim
    k1, k2, k3, k4 = jax.random.split(key, 4)
    # nn.Linear(in, out).weight is [out, in]; we store W.T = [in, out].
    w1 = jax.random.normal(k1, (in_size, hid_dim), jnp.float32) * 0.1
    b1 = jax.random.normal(k2, (1, hid_dim), jnp.float32) * 0.1
    w2 = jax.random.normal(k3, (hid_dim, out_dim), jnp.float32) * 0.1
    b2 = jax.random.normal(k4, (1, out_dim), jnp.float32) * 0.1
    return w1[:skill_dim], w1[skill_dim:], b1, w2, b2


def reference_forward(skill_embedding, state_embedding, params):
    """Pure-JAX reference (identical math to the PyTorch module)."""
    w1_skill, w1_state, b1, w2, b2 = params
    h = skill_embedding @ w1_skill + state_embedding @ w1_state + b1
    h = jnp.where(h > 0.0, h, 0.1 * h)
    logits = h @ w2 + b2
    return jax.nn.softmax(logits, axis=-1)


if __name__ == "__main__":
    skill_dim, state_dim, hid_dim, out_dim = 8, 24, 32, 16
    batch = 256

    key = jax.random.PRNGKey(0)
    k_skill, k_state, k_params = jax.random.split(key, 3)
    skill_embedding = jax.random.normal(k_skill, (batch, skill_dim), jnp.float32)
    state_embedding = jax.random.normal(k_state, (batch, state_dim), jnp.float32)
    params = init_params(k_params, skill_dim, state_dim, hid_dim, out_dim)

    ref = reference_forward(skill_embedding, state_embedding, params)

    # Default path: single full-batch block, grid=(1,) — no pad, no slice.
    out = skill_policy_forward(skill_embedding, state_embedding, params)
    out = jax.block_until_ready(out)
    assert out.shape == (batch, out_dim)
    assert jnp.allclose(out, ref, atol=1e-5, rtol=1e-5)
    assert jnp.allclose(jnp.sum(out, axis=-1), 1.0, atol=1e-5)

    # Also exercise the multi-step (large-B style) tiling path: tb=64, grid=(4,).
    out_tiled = skill_policy_forward(skill_embedding, state_embedding, params,
                                     max_block_b=64)
    out_tiled = jax.block_until_ready(out_tiled)
    assert jnp.allclose(out_tiled, ref, atol=1e-5, rtol=1e-5)

    print("KERNEL_OK")
</pallas_src>

<mosaic_0001>
module attributes {stable_mosaic.version = 11 : i64} {
  func.func @skill_policy_kernel(%arg0: i32, %arg1: memref<256x8xf32, #tpu.memory_space<vmem>>, %arg2: memref<256x24xf32, #tpu.memory_space<vmem>>, %arg3: memref<8x32xf32, #tpu.memory_space<vmem>>, %arg4: memref<24x32xf32, #tpu.memory_space<vmem>>, %arg5: memref<1x32xf32, #tpu.memory_space<vmem>>, %arg6: memref<32x16xf32, #tpu.memory_space<vmem>>, %arg7: memref<1x16xf32, #tpu.memory_space<vmem>>, %arg8: memref<256x16xf32, #tpu.memory_space<vmem>>) attributes {dimension_semantics = [#tpu.dimension_semantics<parallel>], iteration_bounds = array<i64: 1>, scalar_prefetch = 0 : i64, scratch_operands = 0 : i64, tpu.core_type = #tpu.core_type<tc>, window_params = [{transform_indices = @transform_0, window_bounds = array<i64: 256, 8>}, {transform_indices = @transform_1, window_bounds = array<i64: 256, 24>}, {pipeline_mode = #tpu.pipeline_mode<synchronous>, transform_indices = @transform_2, window_bounds = array<i64: 8, 32>}, {pipeline_mode = #tpu.pipeline_mode<synchronous>, transform_indices = @transform_3, window_bounds = array<i64: 24, 32>}, {pipeline_mode = #tpu.pipeline_mode<synchronous>, transform_indices = @transform_4, window_bounds = array<i64: 1, 32>}, {pipeline_mode = #tpu.pipeline_mode<synchronous>, transform_indices = @transform_5, window_bounds = array<i64: 32, 16>}, {pipeline_mode = #tpu.pipeline_mode<synchronous>, transform_indices = @transform_6, window_bounds = array<i64: 1, 16>}, {transform_indices = @transform_7, window_bounds = array<i64: 256, 16>}]} {
    %c0 = arith.constant 0 : index
    %c0_0 = arith.constant 0 : index
    %0 = vector.load %arg1[%c0, %c0_0] : memref<256x8xf32, #tpu.memory_space<vmem>>, vector<256x8xf32>
    %c0_1 = arith.constant 0 : index
    %c0_2 = arith.constant 0 : index
    %1 = vector.load %arg3[%c0_1, %c0_2] : memref<8x32xf32, #tpu.memory_space<vmem>>, vector<8x32xf32>
    %cst = arith.constant dense<0.000000e+00> : vector<256x32xf32>
    %2 = tpu.matmul %0, %1, %cst {dimension_numbers = #tpu.dot_dimension_numbers<[1], [0], [0], [1], [0, 0, 1, 1], [], []>} : vector<256x8xf32>, vector<8x32xf32>, vector<256x32xf32> -> vector<256x32xf32>
    %c0_3 = arith.constant 0 : index
    %c0_4 = arith.constant 0 : index
    %3 = vector.load %arg2[%c0_3, %c0_4] : memref<256x24xf32, #tpu.memory_space<vmem>>, vector<256x24xf32>
    %c0_5 = arith.constant 0 : index
    %c0_6 = arith.constant 0 : index
    %4 = vector.load %arg4[%c0_5, %c0_6] : memref<24x32xf32, #tpu.memory_space<vmem>>, vector<24x32xf32>
    %cst_7 = arith.constant dense<0.000000e+00> : vector<256x32xf32>
    %5 = tpu.matmul %3, %4, %cst_7 {dimension_numbers = #tpu.dot_dimension_numbers<[1], [0], [0], [1], [0, 0, 1, 1], [], []>} : vector<256x24xf32>, vector<24x32xf32>, vector<256x32xf32> -> vector<256x32xf32>
    %6 = arith.addf %2, %5 : vector<256x32xf32>
    %c0_8 = arith.constant 0 : index
    %c0_9 = arith.constant 0 : index
    %7 = vector.load %arg5[%c0_8, %c0_9] : memref<1x32xf32, #tpu.memory_space<vmem>>, vector<1x32xf32>
    %8 = vector.broadcast %7 : vector<1x32xf32> to vector<256x32xf32>
    %9 = arith.addf %6, %8 : vector<256x32xf32>
    %cst_10 = arith.constant 0.000000e+00 : f32
    %10 = vector.broadcast %cst_10 : f32 to vector<256x32xf32>
    %11 = arith.cmpf ogt, %9, %10 : vector<256x32xf32>
    %cst_11 = arith.constant 1.000000e-01 : f32
    %12 = vector.broadcast %cst_11 : f32 to vector<256x32xf32>
    %13 = arith.mulf %12, %9 : vector<256x32xf32>
    %14 = arith.select %11, %9, %13 : vector<256x32xi1>, vector<256x32xf32>
    %c0_12 = arith.constant 0 : index
    %c0_13 = arith.constant 0 : index
    %15 = vector.load %arg6[%c0_12, %c0_13] : memref<32x16xf32, #tpu.memory_space<vmem>>, vector<32x16xf32>
    %cst_14 = arith.constant dense<0.000000e+00> : vector<256x16xf32>
    %16 = tpu.matmul %14, %15, %cst_14 {dimension_numbers = #tpu.dot_dimension_numbers<[1], [0], [0], [1], [0, 0, 1, 1], [], []>} : vector<256x32xf32>, vector<32x16xf32>, vector<256x16xf32> -> vector<256x16xf32>
    %c0_15 = arith.constant 0 : index
    %c0_16 = arith.constant 0 : index
    %17 = vector.load %arg7[%c0_15, %c0_16] : memref<1x16xf32, #tpu.memory_space<vmem>>, vector<1x16xf32>
    %18 = vector.broadcast %17 : vector<1x16xf32> to vector<256x16xf32>
    %19 = arith.addf %16, %18 : vector<256x16xf32>
    %cst_17 = arith.constant dense<0xFF800000> : vector<256xf32>
    %20 = vector.multi_reduction <maximumf>, %19, %cst_17 [1] : vector<256x16xf32> to vector<256xf32>
    %21 = vector.shape_cast %20 : vector<256xf32> to vector<256x1xf32>
    %22 = vector.broadcast %21 : vector<256x1xf32> to vector<256x16xf32>
    %23 = arith.subf %19, %22 : vector<256x16xf32>
    %24 = math.exp %23 : vector<256x16xf32>
    %cst_18 = arith.constant dense<0.000000e+00> : vector<256xf32>
    %25 = vector.multi_reduction <add>, %24, %cst_18 [1] : vector<256x16xf32> to vector<256xf32>
    %26 = vector.shape_cast %25 : vector<256xf32> to vector<256x1xf32>
    %27 = tpu.reciprocal %26 : vector<256x1xf32> -> vector<256x1xf32>
    %28 = vector.broadcast %27 : vector<256x1xf32> to vector<256x16xf32>
    %29 = arith.mulf %24, %28 : vector<256x16xf32>
    %c0_19 = arith.constant 0 : index
    %c0_20 = arith.constant 0 : index
    %30 = vector.load %arg8[%c0_19, %c0_20] : memref<256x16xf32, #tpu.memory_space<vmem>>, vector<256x16xf32>
    tpu.vector_store %arg8[%c0_19, %c0_20], %29 {strides = array<i32>} : memref<256x16xf32, #tpu.memory_space<vmem>>, vector<256x16xf32>,
    return
  }
  func.func @transform_0(%arg0: i32) -> (i32, i32) {
    %c0_i32 = arith.constant 0 : i32
    %c0_i32_0 = arith.constant 0 : i32
    return %arg0, %c0_i32 : i32, i32
  }
  func.func @transform_1(%arg0: i32) -> (i32, i32) {
    %c0_i32 = arith.constant 0 : i32
    %c0_i32_0 = arith.constant 0 : i32
    return %arg0, %c0_i32 : i32, i32
  }
  func.func @transform_2(%arg0: i32) -> (i32, i32) {
    %c0_i32 = arith.constant 0 : i32
    %c0_i32_0 = arith.constant 0 : i32
    %c0_i32_1 = arith.constant 0 : i32
    return %c0_i32, %c0_i32_0 : i32, i32
  }
  func.func @transform_3(%arg0: i32) -> (i32, i32) {
    %c0_i32 = arith.constant 0 : i32
    %c0_i32_0 = arith.constant 0 : i32
    %c0_i32_1 = arith.constant 0 : i32
    return %c0_i32, %c0_i32_0 : i32, i32
  }
  func.func @transform_4(%arg0: i32) -> (i32, i32) {
    %c0_i32 = arith.constant 0 : i32
    %c0_i32_0 = arith.constant 0 : i32
    %c0_i32_1 = arith.constant 0 : i32
    return %c0_i32, %c0_i32_0 : i32, i32
  }
  func.func @transform_5(%arg0: i32) -> (i32, i32) {
    %c0_i32 = arith.constant 0 : i32
    %c0_i32_0 = arith.constant 0 : i32
    %c0_i32_1 = arith.constant 0 : i32
    return %c0_i32, %c0_i32_0 : i32, i32
  }
  func.func @transform_6(%arg0: i32) -> (i32, i32) {
    %c0_i32 = arith.constant 0 : i32
    %c0_i32_0 = arith.constant 0 : i32
    %c0_i32_1 = arith.constant 0 : i32
    return %c0_i32, %c0_i32_0 : i32, i32
  }
  func.func @transform_7(%arg0: i32) -> (i32, i32) {
    %c0_i32 = arith.constant 0 : i32
    %c0_i32_0 = arith.constant 0 : i32
    return %arg0, %c0_i32 : i32, i32
  }
}

</mosaic_0001>

<bundles_post_ra>
// kernel: tpu_custom_call.1
= control target key start
LH: loop header
LB: loop body
LE: loop exit
PB: predicated region body
PF: predicated region fallthrough
CT: control target
= control target key end

     0   :  { %vm94_vm0 = vcmask 195584   ;;  %vm416_vm1 = vcmask 64512   ;;  %vm884_vm4 = vcmask 261120   ;;  %s3055_s3 = inlined_call_operand.vmem [shape: f32[24,32], index: 3, kind: input, shape index: {}]   ;;  %s3056_s1 = inlined_call_operand.vmem [shape: f32[256,24], index: 1, kind: input, shape index: {}]   ;;  %s3057_s2 = inlined_call_operand.vmem [shape: f32[8,32], index: 2, kind: input, shape index: {}]   ;;  %s3058_s5 = inlined_call_operand.vmem [shape: f32[32,16], index: 5, kind: input, shape index: {}]   ;;  %s3059_s0 = inlined_call_operand.vmem [shape: f32[256,8], index: 0, kind: input, shape index: {}]   ;;  %s3060_s4 = inlined_call_operand.vmem [shape: f32[1,32], index: 4, kind: input, shape index: {}]   ;;  %s3061_s6 = inlined_call_operand.vmem [shape: f32[1,16], index: 6, kind: input, shape index: {}]   ;;  %s3062_s7 = inlined_call_operand.vmem [shape: f32[256,16], index: 7, kind: output, shape index: {}]  }
   0x1   :  { %v91_v0 = vld [vmem:[%s3055_s3] sm:$0xff]  ;;  %v92_v1 = vld [vmem:[%s3055_s3 + $0x8] sm:$0xff]  ;;  %v93_v4 = vld [vmem:[%s3055_s3 + $0x10] sm:$0xff] }
   0x2   :  { %v1957_v2 = vpack.c.bf16 %v92_v1, %v91_v0  ;;  %v59_v3 = vld [vmem:[%s3056_s1] sm:$0xff]  ;;  %v60_v5 = vld [vmem:[%s3056_s1 + $0x8] sm:$0xff]  ;;  %v61_v7 = vld [vmem:[%s3056_s1 + $0x10] sm:$0xff] }
   0x3   :  { %1803 = vmatprep.mubr.msk.f32.mxu0 %vm94_vm0, %v59_v3  ;;  %v58_v6 = vld [vmem:[%s3057_s2] sm:$0xff]  ;;  %v62_v8 = vld [vmem:[%s3056_s1 + $0x18] sm:$0xff]  ;;  %v76_v11 = vld [vmem:[%s3056_s1 + $0x88] sm:$0xff] }
   0x4   :  { %1958 = vmatprep.subr.bf16.mxu0 %v1957_v2  ;;  %1969 = vmatprep.subr.bf16.mxu1 %v1957_v2  ;;  %v63_v9 = vld [vmem:[%s3056_s1 + $0x20] sm:$0xff]  ;;  %v77_v12 = vld [vmem:[%s3056_s1 + $0x90] sm:$0xff]  ;;  %v64_v13 = vld [vmem:[%s3056_s1 + $0x28] sm:$0xff] }
   0x5   :  { %1960 = vmatpush3.bf16.msra.mxu0 %v1957_v2  ;;  %1971 = vmatpush3.bf16.msra.mxu1 %v1957_v2  ;;  %v75_v10 = vld [vmem:[%s3056_s1 + $0x80] sm:$0xff]  ;;  %v65_v14 = vld [vmem:[%s3056_s1 + $0x30] sm:$0xff]  ;;  %v78_v15 = vld [vmem:[%s3056_s1 + $0x98] sm:$0xff] }
   0x6   :  { %1801 = vmatprep.subr.mxu0 %v93_v4  ;;  %1970 = vmatprep.subr.mxu1 %v93_v4  ;;  %v79_v16 = vld [vmem:[%s3056_s1 + $0xa0] sm:$0xff]  ;;  %v66_v17 = vld [vmem:[%s3056_s1 + $0x38] sm:$0xff]  ;;  %v80_v19 = vld [vmem:[%s3056_s1 + $0xa8] sm:$0xff] }
   0x7   :  { %1827 = vmatprep.mubr.msk.f32.mxu1 %vm94_vm0, %v75_v10  ;;  %v67_v18 = vld [vmem:[%s3056_s1 + $0x40] sm:$0xff]  ;;  %v81_v20 = vld [vmem:[%s3056_s1 + $0xb0] sm:$0xff]  ;;  %v68_v21 = vld [vmem:[%s3056_s1 + $0x48] sm:$0xff] }
   0x8   :  { %v69_v22 = vld [vmem:[%s3056_s1 + $0x50] sm:$0xff]  ;;  %v82_v23 = vld [vmem:[%s3056_s1 + $0xb8] sm:$0xff]  ;;  %v873_v24 = vld [vmem:[%s3058_s5] sm:$0xff] }
   0x9   :  { %1802 = vmatpush3.msra.mxu0 %v93_v4  ;;  %1972 = vmatpush3.msra.mxu1 %v93_v4  ;;  %v874_v25 = vld [vmem:[%s3058_s5 + $0x8] sm:$0xff]  ;;  %v875_v26 = vld [vmem:[%s3058_s5 + $0x10] sm:$0xff]  ;;  %v876_v27 = vld [vmem:[%s3058_s5 + $0x18] sm:$0xff] }
   0xa   :  { %1804 = vmatmul.mubr.msk.f32.vlgmr.msra.gmra.mrb[0].mxu0 %vm94_vm0, %v60_v5  ;;  %1851 = vmatprep.subr.mxu0 %v58_v6  ;;  %v83_v28 = vld [vmem:[%s3056_s1 + $0xc0] sm:$0xff]  ;;  %v1961_v29 = vpack.c.bf16 %v874_v25, %v873_v24  ;;  %v1965_v30 = vpack.c.bf16 %v876_v27, %v875_v26  ;;  %v70_v31 = vld [vmem:[%s3056_s1 + $0x58] sm:$0xff]  ;;  %v84_v33 = vld [vmem:[%s3056_s1 + $0xc8] sm:$0xff] }
   0xb   :  { %1852 = vmatpush3.msra.mxu0 %v58_v6  ;;  %1806 = vmatprep.mubr.msk.f32.mxu0 %vm94_vm0, %v61_v7  ;;  %v71_v32 = vld [vmem:[%s3056_s1 + $0x60] sm:$0xff]  ;;  %v85_v34 = vld [vmem:[%s3056_s1 + $0xd0] sm:$0xff]  ;;  %v72_v35 = vld [vmem:[%s3056_s1 + $0x68] sm:$0xff] }
   0xc   :  { %1828 = vmatmul.mubr.msk.f32.vlgmr.msra.gmra.mrb[0].mxu1 %vm94_vm0, %v76_v11  ;;  %1962 = vmatprep.subr.bf16.mxu1 %v1961_v29  ;;  %v73_v36 = vld [vmem:[%s3056_s1 + $0x70] sm:$0xff]  ;;  %v86_v37 = vld [vmem:[%s3056_s1 + $0xd8] sm:$0xff]  ;;  %v87_v38 = vld [vmem:[%s3056_s1 + $0xe0] sm:$0xff] }
   0xd   :  { %1830 = vmatprep.mubr.msk.f32.mxu1 %vm94_vm0, %v77_v12  ;;  %1964 = vmatpush3.bf16.msra.mxu1 %v1961_v29  ;;  %v74_v39 = vld [vmem:[%s3056_s1 + $0x78] sm:$0xff]  ;;  %v26_v40 = vld [vmem:[%s3059_s0] sm:$0xff]  ;;  %v88_v41 = vld [vmem:[%s3056_s1 + $0xe8] sm:$0xff] }
   0xe   :  { %1807 = vmatmul.mubr.msk.f32.gmra.mrb[2].mxu0 %vm94_vm0, %v62_v8  ;;  %1966 = vmatprep.subr.bf16.mxu1 %v1965_v30  ;;  %v89_v42 = vld [vmem:[%s3056_s1 + $0xf0] sm:$0xff]  ;;  %v27_v43 = vld [vmem:[%s3059_s0 + $0x8] sm:$0xff]  ;;  %v90_v45 = vld [vmem:[%s3056_s1 + $0xf8] sm:$0xff] }
   0xf   :  { %1809 = vmatprep.mubr.msk.f32.mxu0 %vm94_vm0, %v63_v9  ;;  %v28_v44 = vld [vmem:[%s3059_s0 + $0x10] sm:$0xff]  ;;  %v29_v46 = vld [vmem:[%s3059_s0 + $0x18] sm:$0xff]  ;;  %v30_v47 = vld [vmem:[%s3059_s0 + $0x20] sm:$0xff] }
  0x10   :  { %1831 = vmatmul.mubr.msk.f32.gmra.mrb[2].mxu1 %vm94_vm0, %v78_v15  ;;  %v31_v48 = vld [vmem:[%s3059_s0 + $0x28] sm:$0xff]  ;;  %v32_v49 = vld [vmem:[%s3059_s0 + $0x30] sm:$0xff]  ;;  %v33_v50 = vld [vmem:[%s3059_s0 + $0x38] sm:$0xff] }
  0x11   :  { %1833 = vmatprep.mubr.msk.f32.mxu1 %vm94_vm0, %v79_v16  ;;  %1968 = vmatpush3.bf16.msra.mxu1 %v1965_v30  ;;  %v34_v51 = vld [vmem:[%s3059_s0 + $0x40] sm:$0xff]  ;;  %v35_v52 = vld [vmem:[%s3059_s0 + $0x48] sm:$0xff]  ;;  %v36_v53 = vld [vmem:[%s3059_s0 + $0x50] sm:$0xff] }
  0x12   :  { %1810 = vmatmul.mubr.msk.f32.gmra.mrb[4].mxu0 %vm94_vm0, %v64_v13  ;;  %v37_v54 = vld [vmem:[%s3059_s0 + $0x58] sm:$0xff]  ;;  %v38_v55 = vld [vmem:[%s3059_s0 + $0x60] sm:$0xff]  ;;  %v39_v56 = vld [vmem:[%s3059_s0 + $0x68] sm:$0xff] }
  0x13   :  { %1812 = vmatprep.mubr.msk.f32.mxu0 %vm94_vm0, %v65_v14  ;;  %v40_v57 = vld [vmem:[%s3059_s0 + $0x70] sm:$0xff]  ;;  %v41_v58 = vld [vmem:[%s3059_s0 + $0x78] sm:$0xff]  ;;  %v42_v59 = vld [vmem:[%s3059_s0 + $0x80] sm:$0xff] }
  0x14   :  { %1834 = vmatmul.mubr.msk.f32.gmra.mrb[4].mxu1 %vm94_vm0, %v80_v19  ;;  %v43_v60 = vld [vmem:[%s3059_s0 + $0x88] sm:$0xff]  ;;  %v44_v61 = vld [vmem:[%s3059_s0 + $0x90] sm:$0xff]  ;;  %v45_v62 = vld [vmem:[%s3059_s0 + $0x98] sm:$0xff] }
  0x15   :  { %1836 = vmatprep.mubr.msk.f32.mxu1 %vm94_vm0, %v81_v20  ;;  %v46_v63 = vld [vmem:[%s3059_s0 + $0xa0] sm:$0xff]  ;;  %v47_v0 = vld [vmem:[%s3059_s0 + $0xa8] sm:$0xff]  ;;  %v48_v1 = vld [vmem:[%s3059_s0 + $0xb0] sm:$0xff] }
  0x16   :  { %1813 = vmatmul.mubr.msk.f32.gmra.mrb[6].mxu0 %vm94_vm0, %v66_v17  ;;  %v49_v2 = vld [vmem:[%s3059_s0 + $0xb8] sm:$0xff]  ;;  %v50_v3 = vld [vmem:[%s3059_s0 + $0xc0] sm:$0xff]  ;;  %v51_v4 = vld [vmem:[%s3059_s0 + $0xc8] sm:$0xff] }
  0x17   :  { %1815 = vmatprep.mubr.msk.f32.mxu0 %vm94_vm0, %v67_v18  ;;  %v52_v5 = vld [vmem:[%s3059_s0 + $0xd0] sm:$0xff]  ;;  %v53_v6 = vld [vmem:[%s3059_s0 + $0xd8] sm:$0xff]  ;;  %v54_v7 = vld [vmem:[%s3059_s0 + $0xe0] sm:$0xff] }
  0x18   :  { %1837 = vmatmul.mubr.msk.f32.gmra.mrb[6].mxu1 %vm94_vm0, %v82_v23  ;;  %v55_v8 = vld [vmem:[%s3059_s0 + $0xe8] sm:$0xff]  ;;  %v56_v9 = vld [vmem:[%s3059_s0 + $0xf0] sm:$0xff]  ;;  %v57_v10 = vld [vmem:[%s3059_s0 + $0xf8] sm:$0xff] }
  0x19   :  { %1839 = vmatprep.mubr.msk.f32.mxu1 %vm94_vm0, %v83_v28  ;;  %v2482_v24 = vld [vmem:[%s3060_s4] ss:$0 sm:$0xff] }
  0x1a   :  { %1816 = vmatmul.mubr.msk.f32.gmra.mrb[8].mxu0 %vm94_vm0, %v68_v21 }
  0x1b   :  { %1818 = vmatprep.mubr.msk.f32.mxu0 %vm94_vm0, %v69_v22 }
  0x1c   :  { %1840 = vmatmul.mubr.msk.f32.gmra.mrb[8].mxu1 %vm94_vm0, %v84_v33 }
  0x1d   :  { %1842 = vmatprep.mubr.msk.f32.mxu1 %vm94_vm0, %v85_v34 }
  0x1e   :  { %1819 = vmatmul.mubr.msk.f32.gmra.mrb[10].mxu0 %vm94_vm0, %v70_v31 }
  0x1f   :  { %1821 = vmatprep.mubr.msk.f32.mxu0 %vm94_vm0, %v71_v32 }
  0x20   :  { %1843 = vmatmul.mubr.msk.f32.gmra.mrb[10].mxu1 %vm94_vm0, %v86_v37 }
  0x21   :  { %1845 = vmatprep.mubr.msk.f32.mxu1 %vm94_vm0, %v87_v38 }
  0x22   :  { %1822 = vmatmul.mubr.msk.f32.gmra.mrb[12].mxu0 %vm94_vm0, %v72_v35 }
  0x23   :  { %1824 = vmatprep.mubr.msk.f32.mxu0 %vm94_vm0, %v73_v36 }
  0x24   :  { %1846 = vmatmul.mubr.msk.f32.gmra.mrb[12].mxu1 %vm94_vm0, %v88_v41 }
  0x25   :  { %1848 = vmatprep.mubr.msk.f32.mxu1 %vm94_vm0, %v89_v42 }
  0x26   :  { %1825 = vmatmul.mubr.msk.f32.gmra.mrb[14].mxu0 %vm94_vm0, %v74_v39 }
  0x27   :  { %1853 = vmatprep.mubr.msk.f32.mxu0 %vm416_vm1, %v26_v40 }
  0x28   :  { %1849 = vmatmul.mubr.msk.f32.gmra.mrb[14].mxu1 %vm94_vm0, %v90_v45 }
  0x2a   :  { %1854 = vmatmul.mubr.msk.f32.vlgmr.msra.gmra.mrb[0].mxu0 %vm416_vm1, %v27_v43 }
  0x2b   :  { %1856 = vmatprep.mubr.msk.f32.mxu0 %vm416_vm1, %v28_v44 }
  0x2e   :  { %1857 = vmatmul.mubr.msk.f32.gmra.mrb[2].mxu0 %vm416_vm1, %v29_v46 }
  0x2f   :  { %1859 = vmatprep.mubr.msk.f32.mxu0 %vm416_vm1, %v30_v47 }
  0x32   :  { %1860 = vmatmul.mubr.msk.f32.gmra.mrb[4].mxu0 %vm416_vm1, %v31_v48 }
  0x33   :  { %1862 = vmatprep.mubr.msk.f32.mxu0 %vm416_vm1, %v32_v49 }
  0x36   :  { %1863 = vmatmul.mubr.msk.f32.gmra.mrb[6].mxu0 %vm416_vm1, %v33_v50 }
  0x37   :  { %1865 = vmatprep.mubr.msk.f32.mxu0 %vm416_vm1, %v34_v51 }
  0x3a   :  { %1866 = vmatmul.mubr.msk.f32.gmra.mrb[8].mxu0 %vm416_vm1, %v35_v52 }
  0x3b   :  { %1868 = vmatprep.mubr.msk.f32.mxu0 %vm416_vm1, %v36_v53 }
  0x3e   :  { %1869 = vmatmul.mubr.msk.f32.gmra.mrb[10].mxu0 %vm416_vm1, %v37_v54 }
  0x3f   :  { %1871 = vmatprep.mubr.msk.f32.mxu0 %vm416_vm1, %v38_v55 }
  0x42   :  { %1872 = vmatmul.mubr.msk.f32.gmra.mrb[12].mxu0 %vm416_vm1, %v39_v56 }
  0x43   :  { %1874 = vmatprep.mubr.msk.f32.mxu0 %vm416_vm1, %v40_v57 }
  0x46   :  { %1875 = vmatmul.mubr.msk.f32.gmra.mrb[14].mxu0 %vm416_vm1, %v41_v58 }
  0x47   :  { %1877 = vmatprep.mubr.msk.f32.mxu0 %vm416_vm1, %v42_v59 }
  0x4a   :  { %1878 = vmatmul.mubr.msk.f32.gmra.mrb[16].mxu0 %vm416_vm1, %v43_v60 }
  0x4b   :  { %1880 = vmatprep.mubr.msk.f32.mxu0 %vm416_vm1, %v44_v61 }
  0x4e   :  { %1881 = vmatmul.mubr.msk.f32.gmra.mrb[18].mxu0 %vm416_vm1, %v45_v62 }
  0x4f   :  { %1883 = vmatprep.mubr.msk.f32.mxu0 %vm416_vm1, %v46_v63 }
  0x52   :  { %1884 = vmatmul.mubr.msk.f32.gmra.mrb[20].mxu0 %vm416_vm1, %v47_v0 }
  0x53   :  { %1886 = vmatprep.mubr.msk.f32.mxu0 %vm416_vm1, %v48_v1 }
  0x56   :  { %1887 = vmatmul.mubr.msk.f32.gmra.mrb[22].mxu0 %vm416_vm1, %v49_v2 }
  0x57   :  { %1889 = vmatprep.mubr.msk.f32.mxu0 %vm416_vm1, %v50_v3 }
  0x5a   :  { %1890 = vmatmul.mubr.msk.f32.gmra.mrb[24].mxu0 %vm416_vm1, %v51_v4 }
  0x5b   :  { %1892 = vmatprep.mubr.msk.f32.mxu0 %vm416_vm1, %v52_v5 }
  0x5e   :  { %1893 = vmatmul.mubr.msk.f32.gmra.mrb[26].mxu0 %vm416_vm1, %v53_v6 }
  0x5f   :  { %1895 = vmatprep.mubr.msk.f32.mxu0 %vm416_vm1, %v54_v7 }
  0x62   :  { %1896 = vmatmul.mubr.msk.f32.gmra.mrb[28].mxu0 %vm416_vm1, %v55_v8 }
  0x63   :  { %1898 = vmatprep.mubr.msk.f32.mxu0 %vm416_vm1, %v56_v9 }
  0x66   :  { %1899 = vmatmul.mubr.msk.f32.gmra.mrb[30].mxu0 %vm416_vm1, %v57_v10 }
  0xdf   :  { %v2453_v11 = vpop.f32.mrb[0].mxu1 }
  0xe0   :  { %v2455_v12 = vpop.f32.mrb[1].mxu1 }
  0xe3   :  { %v2457_v13 = vpop.f32.mrb[2].mxu1 }
  0xe4   :  { %v2459_v14 = vpop.f32.mrb[3].mxu1 }
  0xe7   :  { %v2461_v15 = vpop.f32.mrb[4].mxu1 }
  0xe8   :  { %v2463_v16 = vpop.f32.mrb[5].mxu1 }
  0xeb   :  { %v2465_v17 = vpop.f32.mrb[6].mxu1 }
  0xec   :  { %v2467_v18 = vpop.f32.mrb[7].mxu1 }
  0xef   :  { %v2469_v19 = vpop.f32.mrb[8].mxu1 }
  0xf0   :  { %v2471_v20 = vpop.f32.mrb[9].mxu1 }
  0xf3   :  { %v2473_v21 = vpop.f32.mrb[10].mxu1 }
  0xf4   :  { %v2475_v22 = vpop.f32.mrb[11].mxu1 }
  0xf7   :  { %v2477_v23 = vpop.f32.mrb[12].mxu1 }
  0xf8   :  { %v2484_v25 = vpop.f32.mrb[13].mxu1 }
  0xfb   :  { %v2487_v29 = vpop.f32.mrb[14].mxu1 }
  0xfc   :  { %v2490_v31 = vpop.f32.mrb[15].mxu1 }
  0xfd   :  { %v1855_v26 = vpop.f32.mrb[0].mxu0 }
  0xfe   :  { %v746_v27 = vadd.f32 %v1855_v26, %v2482_v24  ;;  %v579_v28 = vpop.f32.mrb[1].mxu0 }
  0xff   :  { %v745_v30 = vadd.f32 %v2482_v24, %v579_v28 }
 0x100   :  { %v810_v32 = vmul.f32 0.1, %v746_v27  ;;  %vm778_vm2 = vcmp.gt.f32.partialorder %v746_v27, 0.0 }
 0x101   :  { %vm777_vm3 = vcmp.gt.f32.partialorder %v745_v30, 0.0  ;;  %v809_v33 = vmul.f32 0.1, %v745_v30  ;;  %v1858_v34 = vpop.f32.mrb[2].mxu0 }
 0x102   :  { %v748_v35 = vadd.f32 %v1858_v34, %v2482_v24  ;;  %v589_v36 = vpop.f32.mrb[3].mxu0  ;;  %v842_v39 = vsel %vm778_vm2, %v746_v27, %v810_v32 }
 0x103   :  { %v747_v37 = vadd.f32 %v2482_v24, %v589_v36  ;;  %v841_v38 = vsel %vm777_vm3, %v745_v30, %v809_v33 }
 0x104   :  { %v812_v40 = vmul.f32 0.1, %v748_v35  ;;  %1909 = vmatprep.mubr.msk.f32.mxu1 %vm884_vm4, %v841_v38  ;;  %vm780_vm5 = vcmp.gt.f32.partialorder %v748_v35, 0.0 }
 0x105   :  { %vm779_vm6 = vcmp.gt.f32.partialorder %v747_v37, 0.0  ;;  %v811_v41 = vmul.f32 0.1, %v747_v37  ;;  %v1861_v42 = vpop.f32.mrb[4].mxu0  ;;  %1910 = vmatmul.mubr.msk.f32.vlgmr.msra.gmra.mrb[16].mxu1 %vm884_vm4, %v842_v39 }
 0x106   :  { %v750_v43 = vadd.f32 %v1861_v42, %v2482_v24  ;;  %v599_v44 = vpop.f32.mrb[5].mxu0  ;;  %v844_v48 = vsel %vm780_vm5, %v748_v35, %v812_v40 }
 0x107   :  { %v749_v45 = vadd.f32 %v2482_v24, %v599_v44  ;;  %v843_v46 = vsel %vm779_vm6, %v747_v37, %v811_v41 }
 0x108   :  { %v814_v47 = vmul.f32 0.1, %v750_v43  ;;  %1912 = vmatprep.mubr.msk.f32.mxu1 %vm884_vm4, %v843_v46  ;;  %vm782_vm7 = vcmp.gt.f32.partialorder %v750_v43, 0.0 }
 0x109   :  { %vm781_vm8 = vcmp.gt.f32.partialorder %v749_v45, 0.0  ;;  %v813_v49 = vmul.f32 0.1, %v749_v45  ;;  %v1864_v50 = vpop.f32.mrb[6].mxu0  ;;  %1913 = vmatmul.mubr.msk.f32.gmra.mrb[18].mxu1 %vm884_vm4, %v844_v48 }
 0x10a   :  { %v752_v51 = vadd.f32 %v1864_v50, %v2482_v24  ;;  %v609_v52 = vpop.f32.mrb[7].mxu0  ;;  %v846_v56 = vsel %vm782_vm7, %v750_v43, %v814_v47 }
 0x10b   :  { %v751_v53 = vadd.f32 %v2482_v24, %v609_v52  ;;  %v845_v54 = vsel %vm781_vm8, %v749_v45, %v813_v49 }
 0x10c   :  { %v816_v55 = vmul.f32 0.1, %v752_v51  ;;  %1915 = vmatprep.mubr.msk.f32.mxu1 %vm884_vm4, %v845_v54  ;;  %vm784_vm9 = vcmp.gt.f32.partialorder %v752_v51, 0.0 }
 0x10d   :  { %vm783_vm10 = vcmp.gt.f32.partialorder %v751_v53, 0.0  ;;  %v815_v57 = vmul.f32 0.1, %v751_v53  ;;  %v1867_v58 = vpop.f32.mrb[8].mxu0  ;;  %1916 = vmatmul.mubr.msk.f32.gmra.mrb[20].mxu1 %vm884_vm4, %v846_v56 }
 0x10e   :  { %v754_v59 = vadd.f32 %v1867_v58, %v2482_v24  ;;  %v619_v60 = vpop.f32.mrb[9].mxu0  ;;  %v848_v0 = vsel %vm784_vm9, %v752_v51, %v816_v55 }
 0x10f   :  { %v753_v61 = vadd.f32 %v2482_v24, %v619_v60  ;;  %v847_v62 = vsel %vm783_vm10, %v751_v53, %v815_v57 }
 0x110   :  { %v818_v63 = vmul.f32 0.1, %v754_v59  ;;  %1918 = vmatprep.mubr.msk.f32.mxu1 %vm884_vm4, %v847_v62  ;;  %vm786_vm11 = vcmp.gt.f32.partialorder %v754_v59, 0.0 }
 0x111   :  { %vm785_vm12 = vcmp.gt.f32.partialorder %v753_v61, 0.0  ;;  %v817_v1 = vmul.f32 0.1, %v753_v61  ;;  %v1870_v2 = vpop.f32.mrb[10].mxu0  ;;  %1919 = vmatmul.mubr.msk.f32.gmra.mrb[22].mxu1 %vm884_vm4, %v848_v0 }
 0x112   :  { %v756_v3 = vadd.f32 %v1870_v2, %v2482_v24  ;;  %v629_v4 = vpop.f32.mrb[11].mxu0  ;;  %v850_v8 = vsel %vm786_vm11, %v754_v59, %v818_v63 }
 0x113   :  { %v755_v5 = vadd.f32 %v2482_v24, %v629_v4  ;;  %v849_v6 = vsel %vm785_vm12, %v753_v61, %v817_v1 }
 0x114   :  { %v820_v7 = vmul.f32 0.1, %v756_v3  ;;  %1921 = vmatprep.mubr.msk.f32.mxu1 %vm884_vm4, %v849_v6  ;;  %vm788_vm13 = vcmp.gt.f32.partialorder %v756_v3, 0.0 }
 0x115   :  { %vm787_vm14 = vcmp.gt.f32.partialorder %v755_v5, 0.0  ;;  %v819_v9 = vmul.f32 0.1, %v755_v5  ;;  %v1873_v10 = vpop.f32.mrb[12].mxu0  ;;  %1922 = vmatmul.mubr.msk.f32.gmra.mrb[24].mxu1 %vm884_vm4, %v850_v8 }
 0x116   :  { %v758_v26 = vadd.f32 %v1873_v10, %v2482_v24  ;;  %v639_v27 = vpop.f32.mrb[13].mxu0  ;;  %v852_v33 = vsel %vm788_vm13, %v756_v3, %v820_v7 }
 0x117   :  { %v757_v28 = vadd.f32 %v2482_v24, %v639_v27  ;;  %v851_v30 = vsel %vm787_vm14, %v755_v5, %v819_v9 }
 0x118   :  { %v822_v32 = vmul.f32 0.1, %v758_v26  ;;  %1924 = vmatprep.mubr.msk.f32.mxu1 %vm884_vm4, %v851_v30  ;;  %vm790_vm15 = vcmp.gt.f32.partialorder %v758_v26, 0.0 }
 0x119   :  { %vm789_vm0 = vcmp.gt.f32.partialorder %v757_v28, 0.0  ;;  %v821_v34 = vmul.f32 0.1, %v757_v28  ;;  %v1876_v35 = vpop.f32.mrb[14].mxu0  ;;  %1925 = vmatmul.mubr.msk.f32.gmra.mrb[26].mxu1 %vm884_vm4, %v852_v33 }
 0x11a   :  { %v760_v36 = vadd.f32 %v1876_v35, %v2482_v24  ;;  %v649_v37 = vpop.f32.mrb[15].mxu0  ;;  %v854_v41 = vsel %vm790_vm15, %v758_v26, %v822_v32 }
 0x11b   :  { %v759_v38 = vadd.f32 %v2482_v24, %v649_v37  ;;  %v853_v39 = vsel %vm789_vm0, %v757_v28, %v821_v34 }
 0x11c   :  { %v824_v40 = vmul.f32 0.1, %v760_v36  ;;  %1927 = vmatprep.mubr.msk.f32.mxu1 %vm884_vm4, %v853_v39  ;;  %vm792_vm1 = vcmp.gt.f32.partialorder %v760_v36, 0.0 }
 0x11d   :  { %vm791_vm2 = vcmp.gt.f32.partialorder %v759_v38, 0.0  ;;  %v823_v42 = vmul.f32 0.1, %v759_v38  ;;  %v1879_v43 = vpop.f32.mrb[16].mxu0  ;;  %1928 = vmatmul.mubr.msk.f32.gmra.mrb[28].mxu1 %vm884_vm4, %v854_v41 }
 0x11e   :  { %v665_v44 = vadd.f32 %v1879_v43, %v2453_v11  ;;  %v659_v45 = vpop.f32.mrb[17].mxu0  ;;  %v856_v49 = vsel %vm792_vm1, %v760_v36, %v824_v40 }
 0x11f   :  { %v660_v46 = vadd.f32 %v659_v45, %v2455_v12  ;;  %v855_v47 = vsel %vm791_vm2, %v759_v38, %v823_v42 }
 0x120   :  { %v762_v48 = vadd.f32 %v2482_v24, %v665_v44  ;;  %1930 = vmatprep.mubr.msk.f32.mxu1 %vm884_vm4, %v855_v47 }
 0x121   :  { %v761_v50 = vadd.f32 %v2482_v24, %v660_v46  ;;  %v1882_v51 = vpop.f32.mrb[18].mxu0  ;;  %1931 = vmatmul.mubr.msk.f32.gmra.mrb[30].mxu1 %vm884_vm4, %v856_v49 }
 0x122   :  { %v826_v52 = vmul.f32 0.1, %v762_v48  ;;  %v675_v53 = vadd.f32 %v1882_v51, %v2457_v13  ;;  %v669_v54 = vpop.f32.mrb[19].mxu0  ;;  %vm794_vm5 = vcmp.gt.f32.partialorder %v762_v48, 0.0 }
 0x123   :  { %v825_v55 = vmul.f32 0.1, %v761_v50  ;;  %v670_v11 = vadd.f32 %v669_v54, %v2459_v14  ;;  %vm793_vm3 = vcmp.gt.f32.partialorder %v761_v50, 0.0 }
 0x124   :  { %v764_v12 = vadd.f32 %v2482_v24, %v675_v53  ;;  %v858_v62 = vsel %vm794_vm5, %v762_v48, %v826_v52  ;;  %vm1206_vm5 = vcmask 130048  }
 0x125   :  { %v763_v56 = vadd.f32 %v2482_v24, %v670_v11  ;;  %v1885_v57 = vpop.f32.mrb[20].mxu0  ;;  %v857_v58 = vsel %vm793_vm3, %v761_v50, %v825_v55 }
 0x126   :  { %v828_v59 = vmul.f32 0.1, %v764_v12  ;;  %v685_v60 = vadd.f32 %v1885_v57, %v2461_v15  ;;  %v679_v61 = vpop.f32.mrb[21].mxu0  ;;  %1933 = vmatprep.mubr.msk.f32.mxu1 %vm884_vm4, %v857_v58  ;;  %vm796_vm7 = vcmp.gt.f32.partialorder %v764_v12, 0.0 }
 0x127   :  { %v827_v13 = vmul.f32 0.1, %v763_v56  ;;  %v680_v63 = vadd.f32 %v679_v61, %v2463_v16  ;;  %1934 = vmatmul.mubr.msk.f32.gmra.mrb[32].mxu1 %vm884_vm4, %v858_v62  ;;  %vm795_vm6 = vcmp.gt.f32.partialorder %v763_v56, 0.0 }
 0x128   :  { %v766_v14 = vadd.f32 %v2482_v24, %v685_v60  ;;  %v860_v5 = vsel %vm796_vm7, %v764_v12, %v828_v59 }
 0x129   :  { %v765_v0 = vadd.f32 %v2482_v24, %v680_v63  ;;  %v1888_v1 = vpop.f32.mrb[22].mxu0  ;;  %v859_v2 = vsel %vm795_vm6, %v763_v56, %v827_v13 }
 0x12a   :  { %v830_v3 = vmul.f32 0.1, %v766_v14  ;;  %v695_v15 = vadd.f32 %v1888_v1, %v2465_v17  ;;  %v689_v4 = vpop.f32.mrb[23].mxu0  ;;  %1936 = vmatprep.mubr.msk.f32.mxu1 %vm884_vm4, %v859_v2  ;;  %vm798_vm9 = vcmp.gt.f32.partialorder %v766_v14, 0.0 }
 0x12b   :  { %v829_v6 = vmul.f32 0.1, %v765_v0  ;;  %v690_v16 = vadd.f32 %v689_v4, %v2467_v18  ;;  %1937 = vmatmul.mubr.msk.f32.gmra.mrb[34].mxu1 %vm884_vm4, %v860_v5  ;;  %vm797_vm8 = vcmp.gt.f32.partialorder %v765_v0, 0.0 }
 0x12c   :  { %v768_v7 = vadd.f32 %v2482_v24, %v695_v15  ;;  %v862_v28 = vsel %vm798_vm9, %v766_v14, %v830_v3 }
 0x12d   :  { %v767_v8 = vadd.f32 %v2482_v24, %v690_v16  ;;  %v1891_v9 = vpop.f32.mrb[24].mxu0  ;;  %v861_v10 = vsel %vm797_vm8, %v765_v0, %v829_v6 }
 0x12e   :  { %v832_v26 = vmul.f32 0.1, %v768_v7  ;;  %v705_v17 = vadd.f32 %v1891_v9, %v2469_v19  ;;  %v699_v27 = vpop.f32.mrb[25].mxu0  ;;  %1939 = vmatprep.mubr.msk.f32.mxu1 %vm884_vm4, %v861_v10  ;;  %vm800_vm11 = vcmp.gt.f32.partialorder %v768_v7, 0.0 }
 0x12f   :  { %v831_v30 = vmul.f32 0.1, %v767_v8  ;;  %v700_v18 = vadd.f32 %v699_v27, %v2471_v20  ;;  %1940 = vmatmul.mubr.msk.f32.gmra.mrb[36].mxu1 %vm884_vm4, %v862_v28  ;;  %vm799_vm10 = vcmp.gt.f32.partialorder %v767_v8, 0.0 }
 0x130   :  { %v770_v32 = vadd.f32 %v2482_v24, %v705_v17  ;;  %v864_v38 = vsel %vm800_vm11, %v768_v7, %v832_v26 }
 0x131   :  { %v769_v33 = vadd.f32 %v2482_v24, %v700_v18  ;;  %v1894_v34 = vpop.f32.mrb[26].mxu0  ;;  %v863_v35 = vsel %vm799_vm10, %v767_v8, %v831_v30 }
 0x132   :  { %v834_v36 = vmul.f32 0.1, %v770_v32  ;;  %v715_v19 = vadd.f32 %v1894_v34, %v2473_v21  ;;  %v709_v37 = vpop.f32.mrb[27].mxu0  ;;  %1942 = vmatprep.mubr.msk.f32.mxu1 %vm884_vm4, %v863_v35  ;;  %vm802_vm13 = vcmp.gt.f32.partialorder %v770_v32, 0.0 }
 0x133   :  { %v833_v39 = vmul.f32 0.1, %v769_v33  ;;  %v710_v20 = vadd.f32 %v709_v37, %v2475_v22  ;;  %1943 = vmatmul.mubr.msk.f32.gmra.mrb[38].mxu1 %vm884_vm4, %v864_v38  ;;  %vm801_vm12 = vcmp.gt.f32.partialorder %v769_v33, 0.0 }
 0x134   :  { %v772_v40 = vadd.f32 %v2482_v24, %v715_v19  ;;  %v866_v46 = vsel %vm802_vm13, %v770_v32, %v834_v36 }
 0x135   :  { %v771_v41 = vadd.f32 %v2482_v24, %v710_v20  ;;  %v1897_v42 = vpop.f32.mrb[28].mxu0  ;;  %v865_v43 = vsel %vm801_vm12, %v769_v33, %v833_v39 }
 0x136   :  { %v836_v44 = vmul.f32 0.1, %v772_v40  ;;  %v725_v21 = vadd.f32 %v1897_v42, %v2477_v23  ;;  %v719_v45 = vpop.f32.mrb[29].mxu0  ;;  %1945 = vmatprep.mubr.msk.f32.mxu1 %vm884_vm4, %v865_v43  ;;  %vm804_vm15 = vcmp.gt.f32.partialorder %v772_v40, 0.0 }
 0x137   :  { %v835_v47 = vmul.f32 0.1, %v771_v41  ;;  %v720_v22 = vadd.f32 %v719_v45, %v2484_v25  ;;  %1946 = vmatmul.mubr.msk.f32.gmra.mrb[40].mxu1 %vm884_vm4, %v866_v46  ;;  %vm803_vm14 = vcmp.gt.f32.partialorder %v771_v41, 0.0 }
 0x138   :  { %v774_v48 = vadd.f32 %v2482_v24, %v725_v21  ;;  %v868_v54 = vsel %vm804_vm15, %v772_v40, %v836_v44 }
 0x139   :  { %v773_v49 = vadd.f32 %v2482_v24, %v720_v22  ;;  %v1900_v50 = vpop.f32.mrb[30].mxu0  ;;  %v867_v51 = vsel %vm803_vm14, %v771_v41, %v835_v47 }
 0x13a   :  { %v838_v52 = vmul.f32 0.1, %v774_v48  ;;  %v735_v23 = vadd.f32 %v1900_v50, %v2487_v29  ;;  %v729_v53 = vpop.f32.mrb[31].mxu0  ;;  %1948 = vmatprep.mubr.msk.f32.mxu1 %vm884_vm4, %v867_v51  ;;  %vm806_vm1 = vcmp.gt.f32.partialorder %v774_v48, 0.0 }
 0x13b   :  { %v837_v55 = vmul.f32 0.1, %v773_v49  ;;  %v730_v25 = vadd.f32 %v729_v53, %v2490_v31  ;;  %1949 = vmatmul.mubr.msk.f32.gmra.mrb[42].mxu1 %vm884_vm4, %v868_v54  ;;  %vm805_vm0 = vcmp.gt.f32.partialorder %v773_v49, 0.0 }
 0x13c   :  { %v776_v11 = vadd.f32 %v2482_v24, %v735_v23  ;;  %v870_v29 = vsel %vm806_vm1, %v774_v48, %v838_v52 }
 0x13d   :  { %v775_v12 = vadd.f32 %v2482_v24, %v730_v25  ;;  %v869_v56 = vsel %vm805_vm0, %v773_v49, %v837_v55  ;;  %v2573_v24 = vld [vmem:[%s3061_s6] ss:$0 sm:$0xff] }
 0x13e   :  { %v840_v57 = vmul.f32 0.1, %v776_v11  ;;  %1951 = vmatprep.mubr.msk.f32.mxu1 %vm884_vm4, %v869_v56  ;;  %vm808_vm3 = vcmp.gt.f32.partialorder %v776_v11, 0.0 }
 0x13f   :  { %v839_v58 = vmul.f32 0.1, %v775_v12  ;;  %1952 = vmatmul.mubr.msk.f32.gmra.mrb[44].mxu1 %vm884_vm4, %v870_v29  ;;  %vm807_vm2 = vcmp.gt.f32.partialorder %v775_v12, 0.0 }
 0x140   :  { %v872_v31 = vsel %vm808_vm3, %v776_v11, %v840_v57 }
 0x141   :  { %v871_v59 = vsel %vm807_vm2, %v775_v12, %v839_v58 }
 0x142   :  { %1954 = vmatprep.mubr.msk.f32.mxu1 %vm884_vm4, %v871_v59 }
 0x143   :  { %1955 = vmatmul.mubr.msk.f32.gmra.mrb[46].mxu1 %vm884_vm4, %v872_v31 }
 0x1d8   :  { %v1911_v60 = vpop.f32.mrb[16].mxu1 }
 0x1d9   :  { %v2576_v61 = vadd.f32 %v1911_v60, %v2573_v24  ;;  %v1047_v62 = vpop.f32.mrb[17].mxu1 }
 0x1da   :  { %v2579_v13 = vadd.f32 %v2573_v24, %v1047_v62 }
 0x1db   :  { %v1210_v63 = vsel %vm1206_vm5, %v2576_v61, -inf }
 0x1dc   :  { %1211 = vmax.xlane.f32.xlu0 %v1210_v63  ;;  %v1914_v14 = vpop.f32.mrb[18].mxu1  ;;  %v1207_v3 = vsel %vm1206_vm5, %v2579_v13, -inf }
 0x1dd   :  { %v2584_v0 = vadd.f32 %v1914_v14, %v2573_v24  ;;  %v1057_v1 = vpop.f32.mrb[19].mxu1 }
 0x1de   :  { %v2587_v2 = vadd.f32 %v2573_v24, %v1057_v1 }
 0x1df   :  { %v1216_v15 = vsel %vm1206_vm5, %v2584_v0, -inf }
 0x1e0   :  { %1208 = vmax.xlane.f32.xlu0 %v1207_v3  ;;  %1217 = vmax.xlane.f32.xlu1 %v1216_v15  ;;  %v1917_v4 = vpop.f32.mrb[20].mxu1  ;;  %v1213_v7 = vsel %vm1206_vm5, %v2587_v2, -inf }
 0x1e1   :  { %v1067_v5 = vpop.f32.mrb[21].mxu1  ;;  %v2597_v16 = vadd.f32 %v1917_v4, %v2573_v24 }
 0x1e2   :  { %v2594_v6 = vadd.f32 %v2573_v24, %v1067_v5 }
 0x1e3   :  { %v1222_v27 = vsel %vm1206_vm5, %v2597_v16, -inf }
 0x1e4   :  { %1214 = vmax.xlane.f32.xlu1 %v1213_v7  ;;  %v1920_v8 = vpop.f32.mrb[22].mxu1  ;;  %v1219_v9 = vsel %vm1206_vm5, %v2594_v6, -inf }
 0x1e5   :  { %1220 = vmax.xlane.f32.xlu0 %v1219_v9  ;;  %v1077_v10 = vpop.f32.mrb[23].mxu1  ;;  %v2607_v17 = vadd.f32 %v1920_v8, %v2573_v24 }
 0x1e6   :  { %v2604_v26 = vadd.f32 %v2573_v24, %v1077_v10 }
 0x1e7   :  { %v1228_v34 = vsel %vm1206_vm5, %v2607_v17, -inf }
 0x1e8   :  { %1223 = vmax.xlane.f32.xlu1 %v1222_v27  ;;  %v1923_v28 = vpop.f32.mrb[24].mxu1  ;;  %v1225_v30 = vsel %vm1206_vm5, %v2604_v26, -inf }
 0x1e9   :  { %1226 = vmax.xlane.f32.xlu0 %v1225_v30  ;;  %v1087_v18 = vpop.f32.mrb[25].mxu1  ;;  %v2617_v33 = vadd.f32 %v1923_v28, %v2573_v24 }
 0x1ea   :  { %v2614_v32 = vadd.f32 %v2573_v24, %v1087_v18 }
 0x1eb   :  { %v1234_v39 = vsel %vm1206_vm5, %v2617_v33, -inf }
 0x1ec   :  { %1229 = vmax.xlane.f32.xlu1 %v1228_v34  ;;  %v1926_v35 = vpop.f32.mrb[26].mxu1  ;;  %v1231_v36 = vsel %vm1206_vm5, %v2614_v32, -inf }
 0x1ed   :  { %1232 = vmax.xlane.f32.xlu0 %v1231_v36  ;;  %v1097_v19 = vpop.f32.mrb[27].mxu1  ;;  %v2627_v38 = vadd.f32 %v1926_v35, %v2573_v24 }
 0x1ee   :  { %v2624_v37 = vadd.f32 %v2573_v24, %v1097_v19 }
 0x1ef   :  { %v1240_v44 = vsel %vm1206_vm5, %v2627_v38, -inf }
 0x1f0   :  { %1235 = vmax.xlane.f32.xlu1 %v1234_v39  ;;  %v1929_v20 = vpop.f32.mrb[28].mxu1  ;;  %v1237_v40 = vsel %vm1206_vm5, %v2624_v37, -inf }
 0x1f1   :  { %1238 = vmax.xlane.f32.xlu0 %v1237_v40  ;;  %v1107_v41 = vpop.f32.mrb[29].mxu1  ;;  %v2637_v43 = vadd.f32 %v1929_v20, %v2573_v24 }
 0x1f2   :  { %v2634_v42 = vadd.f32 %v2573_v24, %v1107_v41 }
 0x1f3   :  { %v1246_v48 = vsel %vm1206_vm5, %v2637_v43, -inf }
 0x1f4   :  { %1241 = vmax.xlane.f32.xlu1 %v1240_v44  ;;  %v1932_v21 = vpop.f32.mrb[30].mxu1  ;;  %v1243_v45 = vsel %vm1206_vm5, %v2634_v42, -inf }
 0x1f5   :  { %1244 = vmax.xlane.f32.xlu0 %v1243_v45  ;;  %v1117_v46 = vpop.f32.mrb[31].mxu1  ;;  %v2647_v22 = vadd.f32 %v1932_v21, %v2573_v24 }
 0x1f6   :  { %v2644_v47 = vadd.f32 %v2573_v24, %v1117_v46 }
 0x1f7   :  { %v1252_v23 = vsel %vm1206_vm5, %v2647_v22, -inf }
 0x1f8   :  { %1247 = vmax.xlane.f32.xlu1 %v1246_v48  ;;  %v1249_v49 = vsel %vm1206_vm5, %v2644_v47, -inf }
 0x1f9   :  { %1250 = vmax.xlane.f32.xlu0 %v1249_v49 }
 0x1fa   :  { %v1935_v50 = vpop.f32.mrb[32].mxu1 }
 0x1fb   :  { %v2654_v51 = vadd.f32 %v1935_v50, %v2573_v24  ;;  %v1127_v52 = vpop.f32.mrb[33].mxu1 }
 0x1fc   :  { %v2659_v53 = vadd.f32 %v2573_v24, %v1127_v52  ;;  %1253 = vmax.xlane.f32.xlu1 %v1252_v23 }
 0x1fd   :  { %v1258_v12 = vsel %vm1206_vm5, %v2654_v51, -inf }
 0x1fe   :  { %v1938_v54 = vpop.f32.mrb[34].mxu1  ;;  %v1255_v55 = vsel %vm1206_vm5, %v2659_v53, -inf }
 0x1ff   :  { %v2664_v25 = vadd.f32 %v1938_v54, %v2573_v24  ;;  %v1137_v11 = vpop.f32.mrb[35].mxu1  ;;  %1256 = vmax.xlane.f32.xlu0 %v1255_v55 }
 0x200   :  { %v2669_v56 = vadd.f32 %v2573_v24, %v1137_v11  ;;  %1259 = vmax.xlane.f32.xlu1 %v1258_v12 }
 0x201   :  { %v1264_v31 = vsel %vm1206_vm5, %v2664_v25, -inf }
 0x202   :  { %v1941_v57 = vpop.f32.mrb[36].mxu1  ;;  %v1261_v29 = vsel %vm1206_vm5, %v2669_v56, -inf }
 0x203   :  { %v2674_v58 = vadd.f32 %v1941_v57, %v2573_v24  ;;  %v1147_v59 = vpop.f32.mrb[37].mxu1  ;;  %1262 = vmax.xlane.f32.xlu0 %v1261_v29 }
 0x204   :  { %v2679_v60 = vadd.f32 %v2573_v24, %v1147_v59  ;;  %1265 = vmax.xlane.f32.xlu1 %v1264_v31 }
 0x205   :  { %v1270_v3 = vsel %vm1206_vm5, %v2674_v58, -inf }
 0x206   :  { %v1944_v62 = vpop.f32.mrb[38].mxu1  ;;  %v1267_v63 = vsel %vm1206_vm5, %v2679_v60, -inf }
 0x207   :  { %v2684_v14 = vadd.f32 %v1944_v62, %v2573_v24  ;;  %v1157_v1 = vpop.f32.mrb[39].mxu1  ;;  %1268 = vmax.xlane.f32.xlu0 %v1267_v63 }
 0x208   :  { %v2689_v15 = vadd.f32 %v2573_v24, %v1157_v1  ;;  %1271 = vmax.xlane.f32.xlu1 %v1270_v3 }
 0x209   :  { %v1276_v9 = vsel %vm1206_vm5, %v2684_v14, -inf }
 0x20a   :  { %v1947_v4 = vpop.f32.mrb[40].mxu1  ;;  %v1273_v5 = vsel %vm1206_vm5, %v2689_v15, -inf }
 0x20b   :  { %v2694_v7 = vadd.f32 %v1947_v4, %v2573_v24  ;;  %v1167_v8 = vpop.f32.mrb[41].mxu1  ;;  %1274 = vmax.xlane.f32.xlu0 %v1273_v5 }
 0x20c   :  { %v2699_v10 = vadd.f32 %v2573_v24, %v1167_v8  ;;  %1277 = vmax.xlane.f32.xlu1 %v1276_v9 }
 0x20d   :  { %v1282_v34 = vsel %vm1206_vm5, %v2694_v7, -inf }
 0x20e   :  { %v1950_v27 = vpop.f32.mrb[42].mxu1  ;;  %v1279_v28 = vsel %vm1206_vm5, %v2699_v10, -inf }
 0x20f   :  { %v2704_v30 = vadd.f32 %v1950_v27, %v2573_v24  ;;  %v1177_v18 = vpop.f32.mrb[43].mxu1  ;;  %1280 = vmax.xlane.f32.xlu0 %v1279_v28 }
 0x210   :  { %v2709_v35 = vadd.f32 %v2573_v24, %v1177_v18  ;;  %1283 = vmax.xlane.f32.xlu1 %v1282_v34 }
 0x211   :  { %v1288_v40 = vsel %vm1206_vm5, %v2704_v30, -inf }
 0x212   :  { %v1953_v36 = vpop.f32.mrb[44].mxu1  ;;  %v1285_v19 = vsel %vm1206_vm5, %v2709_v35, -inf }
 0x213   :  { %v2714_v39 = vadd.f32 %v1953_v36, %v2573_v24  ;;  %v1187_v20 = vpop.f32.mrb[45].mxu1  ;;  %1286 = vmax.xlane.f32.xlu0 %v1285_v19 }
 0x214   :  { %v2719_v41 = vadd.f32 %v2573_v24, %v1187_v20  ;;  %1289 = vmax.xlane.f32.xlu1 %v1288_v40 }
 0x215   :  { %v1294_v48 = vsel %vm1206_vm5, %v2714_v39, -inf }
 0x216   :  { %v1956_v44 = vpop.f32.mrb[46].mxu1  ;;  %v1291_v21 = vsel %vm1206_vm5, %v2719_v41, -inf }
 0x217   :  { %v2724_v45 = vadd.f32 %v1956_v44, %v2573_v24  ;;  %v1197_v46 = vpop.f32.mrb[47].mxu1  ;;  %1292 = vmax.xlane.f32.xlu0 %v1291_v21 }
 0x218   :  { %v2729_v49 = vadd.f32 %v2573_v24, %v1197_v46  ;;  %1295 = vmax.xlane.f32.xlu1 %v1294_v48 }
 0x219   :  { %v1300_v52 = vsel %vm1206_vm5, %v2724_v45, -inf }
 0x21a   :  { %v1297_v50 = vsel %vm1206_vm5, %v2729_v49, -inf }
 0x21b   :  { %1298 = vmax.xlane.f32.xlu0 %v1297_v50 }
 0x21c   :  { %1301 = vmax.xlane.f32.xlu1 %v1300_v52 }
 0x269   :  { %v1212_v23 = vpop.xlane.xlu0 %1211 }
 0x26a   :  { %v1304_v54 = vsub.f32 %v2576_v61, %v1212_v23 }
 0x26c   :  { %v1337_v55 = vmul.f32 1.442695, %v1304_v54 }
 0x26d   :  { %v1209_v11 = vpop.xlane.xlu0 %1208  ;;  %v1218_v12 = vpop.xlane.xlu1 %1217 }
 0x26e   :  { %2005 = vpow2.f32 %v1337_v55  ;;  %v1303_v57 = vsub.f32 %v2579_v13, %v1209_v11  ;;  %v1306_v24 = vsub.f32 %v2584_v0, %v1218_v12 }
 0x270   :  { %v1335_v29 = vmul.f32 1.442695, %v1303_v57  ;;  %v1341_v59 = vmul.f32 1.442695, %v1306_v24 }
 0x271   :  { %v1215_v31 = vpop.xlane.xlu1 %1214 }
 0x272   :  { %2007 = vpow2.f32 %v1335_v29  ;;  %v1305_v62 = vsub.f32 %v2587_v2, %v1215_v31  ;;  %v1221_v63 = vpop.xlane.xlu0 %1220 }
 0x273   :  { %2009 = vpow2.f32 %v1341_v59  ;;  %v1307_v1 = vsub.f32 %v2594_v6, %v1221_v63 }
 0x274   :  { %v1339_v3 = vmul.f32 1.442695, %v1305_v62 }
 0x275   :  { %v1343_v61 = vmul.f32 1.442695, %v1307_v1  ;;  %v1224_v4 = vpop.xlane.xlu1 %1223 }
 0x276   :  { %2011 = vpow2.f32 %v1339_v3  ;;  %v1308_v5 = vsub.f32 %v2597_v16, %v1224_v4  ;;  %v1227_v8 = vpop.xlane.xlu0 %1226 }
 0x277   :  { %v1309_v13 = vsub.f32 %v2604_v26, %v1227_v8  ;;  %2013 = vpow2.f32 %v1343_v61 }
 0x278   :  { %v2742_v0 = vpop.eup %2005  ;;  %v1345_v9 = vmul.f32 1.442695, %v1308_v5 }
 0x279   :  { %v1347_v27 = vmul.f32 1.442695, %v1309_v13  ;;  %v1230_v28 = vpop.xlane.xlu1 %1229  ;;  %v1402_v2 = vsel %vm1206_vm5, %v2742_v0, 0.0 }
 0x27a   :  { %2015 = vpow2.f32 %v1345_v9  ;;  %v1310_v6 = vsub.f32 %v2607_v17, %v1230_v28  ;;  %v1233_v18 = vpop.xlane.xlu0 %1232  ;;  %1403 = vadd.xlane.f32.xlu1 %v1402_v2 }
 0x27b   :  { %v1311_v34 = vsub.f32 %v2614_v32, %v1233_v18  ;;  %2017 = vpow2.f32 %v1347_v27 }
 0x27c   :  { %v2748_v16 = vpop.eup %2007  ;;  %v1349_v26 = vmul.f32 1.442695, %v1310_v6 }
 0x27d   :  { %v2750_v36 = vpop.eup %2009  ;;  %v1351_v19 = vmul.f32 1.442695, %v1311_v34  ;;  %v1236_v20 = vpop.xlane.xlu1 %1235  ;;  %v1399_v40 = vsel %vm1206_vm5, %v2748_v16, 0.0 }
 0x27e   :  { %2019 = vpow2.f32 %v1349_v26  ;;  %v1312_v44 = vsub.f32 %v2617_v33, %v1236_v20  ;;  %v1239_v21 = vpop.xlane.xlu0 %1238  ;;  %v1408_v17 = vsel %vm1206_vm5, %v2750_v36, 0.0  ;;  %1400 = vadd.xlane.f32.xlu0 %v1399_v40 }
 0x27f   :  { %v1313_v32 = vsub.f32 %v2624_v37, %v1239_v21  ;;  %1409 = vadd.xlane.f32.xlu1 %v1408_v17  ;;  %2021 = vpow2.f32 %v1351_v19 }
 0x280   :  { %v2758_v46 = vpop.eup %2011  ;;  %v1353_v48 = vmul.f32 1.442695, %v1312_v44 }
 0x281   :  { %v1355_v50 = vmul.f32 1.442695, %v1313_v32  ;;  %v1242_v52 = vpop.xlane.xlu1 %1241  ;;  %v1405_v23 = vsel %vm1206_vm5, %v2758_v46, 0.0  ;;  %v2762_v54 = vpop.eup %2013 }
 0x282   :  { %2023 = vpow2.f32 %v1353_v48  ;;  %v1314_v33 = vsub.f32 %v2627_v38, %v1242_v52  ;;  %v1245_v55 = vpop.xlane.xlu0 %1244  ;;  %1406 = vadd.xlane.f32.xlu0 %v1405_v23  ;;  %v1411_v59 = vsel %vm1206_vm5, %v2762_v54, 0.0 }
 0x283   :  { %v1315_v11 = vsub.f32 %v2634_v42, %v1245_v55  ;;  %2025 = vpow2.f32 %v1355_v50 }
 0x284   :  { %v2766_v37 = vpop.eup %2015  ;;  %v1357_v12 = vmul.f32 1.442695, %v1314_v33 }
 0x285   :  { %v1359_v57 = vmul.f32 1.442695, %v1315_v11  ;;  %v1248_v24 = vpop.xlane.xlu1 %1247  ;;  %v1414_v29 = vsel %vm1206_vm5, %v2766_v37, 0.0  ;;  %v2772_v31 = vpop.eup %2017 }
 0x286   :  { %2027 = vpow2.f32 %v1357_v12  ;;  %v1316_v38 = vsub.f32 %v2637_v43, %v1248_v24  ;;  %v1251_v62 = vpop.xlane.xlu0 %1250  ;;  %1415 = vadd.xlane.f32.xlu1 %v1414_v29  ;;  %1412 = vadd.xlane.f32.xlu0 %v1411_v59  ;;  %v1417_v5 = vsel %vm1206_vm5, %v2772_v31, 0.0 }
 0x287   :  { %v1317_v42 = vsub.f32 %v2644_v47, %v1251_v62  ;;  %2029 = vpow2.f32 %v1359_v57 }
 0x288   :  { %v2776_v63 = vpop.eup %2019  ;;  %v1361_v1 = vmul.f32 1.442695, %v1316_v38 }
 0x289   :  { %v1363_v3 = vmul.f32 1.442695, %v1317_v42  ;;  %v1254_v61 = vpop.xlane.xlu1 %1253  ;;  %v1420_v4 = vsel %vm1206_vm5, %v2776_v63, 0.0  ;;  %v2782_v8 = vpop.eup %2021 }
 0x28a   :  { %2031 = vpow2.f32 %v1361_v1  ;;  %v1318_v43 = vsub.f32 %v2647_v22, %v1254_v61  ;;  %1421 = vadd.xlane.f32.xlu1 %v1420_v4  ;;  %1418 = vadd.xlane.f32.xlu0 %v1417_v5  ;;  %v1423_v6 = vsel %vm1206_vm5, %v2782_v8, 0.0 }
 0x28b   :  { %2033 = vpow2.f32 %v1363_v3 }
 0x28c   :  { %v2785_v47 = vpop.eup %2023  ;;  %v1365_v13 = vmul.f32 1.442695, %v1318_v43  ;;  %v1257_v9 = vpop.xlane.xlu0 %1256 }
 0x28d   :  { %v1319_v27 = vsub.f32 %v2659_v53, %v1257_v9  ;;  %v1260_v28 = vpop.xlane.xlu1 %1259  ;;  %v1426_v2 = vsel %vm1206_vm5, %v2785_v47, 0.0  ;;  %v2792_v18 = vpop.eup %2025 }
 0x28e   :  { %2035 = vpow2.f32 %v1365_v13  ;;  %v1320_v22 = vsub.f32 %v2654_v51, %v1260_v28  ;;  %1427 = vadd.xlane.f32.xlu1 %v1426_v2  ;;  %1424 = vadd.xlane.f32.xlu0 %v1423_v6  ;;  %v1429_v21 = vsel %vm1206_vm5, %v2792_v18, 0.0 }
 0x28f   :  { %v1367_v34 = vmul.f32 1.442695, %v1319_v27 }
 0x290   :  { %v2795_v26 = vpop.eup %2027  ;;  %v1369_v19 = vmul.f32 1.442695, %v1320_v22  ;;  %v1263_v20 = vpop.xlane.xlu0 %1262 }
 0x291   :  { %2037 = vpow2.f32 %v1367_v34  ;;  %v1321_v53 = vsub.f32 %v2669_v56, %v1263_v20  ;;  %v1266_v40 = vpop.xlane.xlu1 %1265  ;;  %v1432_v44 = vsel %vm1206_vm5, %v2795_v26, 0.0  ;;  %v2802_v17 = vpop.eup %2029 }
 0x292   :  { %2039 = vpow2.f32 %v1369_v19  ;;  %v1322_v51 = vsub.f32 %v2664_v25, %v1266_v40  ;;  %1433 = vadd.xlane.f32.xlu1 %v1432_v44  ;;  %1430 = vadd.xlane.f32.xlu0 %v1429_v21  ;;  %v1435_v55 = vsel %vm1206_vm5, %v2802_v17, 0.0 }
 0x293   :  { %v1371_v32 = vmul.f32 1.442695, %v1321_v53 }
 0x294   :  { %v2805_v48 = vpop.eup %2031  ;;  %v1373_v50 = vmul.f32 1.442695, %v1322_v51  ;;  %v1269_v52 = vpop.xlane.xlu0 %1268 }
 0x295   :  { %2041 = vpow2.f32 %v1371_v32  ;;  %v1323_v56 = vsub.f32 %v2679_v60, %v1269_v52  ;;  %v1272_v23 = vpop.xlane.xlu1 %1271  ;;  %v1438_v33 = vsel %vm1206_vm5, %v2805_v48, 0.0  ;;  %v2812_v11 = vpop.eup %2033 }
 0x296   :  { %2043 = vpow2.f32 %v1373_v50  ;;  %v1324_v25 = vsub.f32 %v2674_v58, %v1272_v23  ;;  %1439 = vadd.xlane.f32.xlu1 %v1438_v33  ;;  %1436 = vadd.xlane.f32.xlu0 %v1435_v55  ;;  %v1441_v62 = vsel %vm1206_vm5, %v2812_v11, 0.0 }
 0x297   :  { %v1375_v12 = vmul.f32 1.442695, %v1323_v56 }
 0x298   :  { %v2815_v57 = vpop.eup %2035  ;;  %v1377_v24 = vmul.f32 1.442695, %v1324_v25  ;;  %v1275_v29 = vpop.xlane.xlu0 %1274 }
 0x299   :  { %2045 = vpow2.f32 %v1375_v12  ;;  %v1325_v60 = vsub.f32 %v2689_v15, %v1275_v29  ;;  %v1278_v59 = vpop.xlane.xlu1 %1277  ;;  %v1444_v38 = vsel %vm1206_vm5, %v2815_v57, 0.0 }
 0x29a   :  { %2047 = vpow2.f32 %v1377_v24  ;;  %v1326_v58 = vsub.f32 %v2684_v14, %v1278_v59  ;;  %1445 = vadd.xlane.f32.xlu1 %v1444_v38  ;;  %1442 = vadd.xlane.f32.xlu0 %v1441_v62 }
 0x29b   :  { %v2823_v42 = vpop.eup %2037  ;;  %v1379_v1 = vmul.f32 1.442695, %v1325_v60 }
 0x29c   :  { %v2825_v3 = vpop.eup %2039  ;;  %v1381_v61 = vmul.f32 1.442695, %v1326_v58  ;;  %v1281_v4 = vpop.xlane.xlu0 %1280  ;;  %v1447_v15 = vsel %vm1206_vm5, %v2823_v42, 0.0 }
 0x29d   :  { %2049 = vpow2.f32 %v1379_v1  ;;  %v1327_v5 = vsub.f32 %v2699_v10, %v1281_v4  ;;  %v1284_v43 = vpop.xlane.xlu1 %1283  ;;  %v1450_v13 = vsel %vm1206_vm5, %v2825_v3, 0.0 }
 0x29e   :  { %2051 = vpow2.f32 %v1381_v61  ;;  %v1328_v14 = vsub.f32 %v2694_v7, %v1284_v43  ;;  %1451 = vadd.xlane.f32.xlu1 %v1450_v13  ;;  %1448 = vadd.xlane.f32.xlu0 %v1447_v15 }
 0x29f   :  { %v2833_v9 = vpop.eup %2041  ;;  %v1383_v27 = vmul.f32 1.442695, %v1327_v5 }
 0x2a0   :  { %v2835_v28 = vpop.eup %2043  ;;  %v1385_v2 = vmul.f32 1.442695, %v1328_v14  ;;  %v1287_v6 = vpop.xlane.xlu0 %1286  ;;  %v1453_v22 = vsel %vm1206_vm5, %v2833_v9, 0.0 }
 0x2a1   :  { %2053 = vpow2.f32 %v1383_v27  ;;  %v1329_v10 = vsub.f32 %v2709_v35, %v1287_v6  ;;  %v1290_v34 = vpop.xlane.xlu1 %1289  ;;  %v1456_v19 = vsel %vm1206_vm5, %v2835_v28, 0.0 }
 0x2a2   :  { %2055 = vpow2.f32 %v1385_v2  ;;  %v1330_v7 = vsub.f32 %v2704_v30, %v1290_v34  ;;  %1457 = vadd.xlane.f32.xlu1 %v1456_v19  ;;  %1454 = vadd.xlane.f32.xlu0 %v1453_v22 }
 0x2a3   :  { %v2843_v20 = vpop.eup %2045  ;;  %v1387_v53 = vmul.f32 1.442695, %v1329_v10 }
 0x2a4   :  { %v2845_v40 = vpop.eup %2047  ;;  %v1389_v44 = vmul.f32 1.442695, %v1330_v7  ;;  %v1293_v21 = vpop.xlane.xlu0 %1292  ;;  %v1459_v51 = vsel %vm1206_vm5, %v2843_v20, 0.0 }
 0x2a5   :  { %2057 = vpow2.f32 %v1387_v53  ;;  %v1331_v35 = vsub.f32 %v2719_v41, %v1293_v21  ;;  %v1296_v32 = vpop.xlane.xlu1 %1295  ;;  %v1462_v50 = vsel %vm1206_vm5, %v2845_v40, 0.0 }
 0x2a6   :  { %2059 = vpow2.f32 %v1389_v44  ;;  %v1332_v30 = vsub.f32 %v2714_v39, %v1296_v32  ;;  %1463 = vadd.xlane.f32.xlu1 %v1462_v50  ;;  %1460 = vadd.xlane.f32.xlu0 %v1459_v51 }
 0x2a7   :  { %v2853_v52 = vpop.eup %2049  ;;  %v1391_v56 = vmul.f32 1.442695, %v1331_v35 }
 0x2a8   :  { %v2855_v23 = vpop.eup %2051  ;;  %v1393_v33 = vmul.f32 1.442695, %v1332_v30  ;;  %v1299_v55 = vpop.xlane.xlu0 %1298  ;;  %v1465_v25 = vsel %vm1206_vm5, %v2853_v52, 0.0 }
 0x2a9   :  { %2061 = vpow2.f32 %v1391_v56  ;;  %v1333_v41 = vsub.f32 %v2729_v49, %v1299_v55  ;;  %v1302_v12 = vpop.xlane.xlu1 %1301  ;;  %v1468_v24 = vsel %vm1206_vm5, %v2855_v23, 0.0 }
 0x2aa   :  { %2063 = vpow2.f32 %v1393_v33  ;;  %v1334_v39 = vsub.f32 %v2724_v45, %v1302_v12  ;;  %1469 = vadd.xlane.f32.xlu1 %v1468_v24  ;;  %1466 = vadd.xlane.f32.xlu0 %v1465_v25 }
 0x2ab   :  { %v2863_v29 = vpop.eup %2053  ;;  %v1395_v60 = vmul.f32 1.442695, %v1333_v41 }
 0x2ac   :  { %v2865_v59 = vpop.eup %2055  ;;  %v1397_v38 = vmul.f32 1.442695, %v1334_v39  ;;  %v1471_v62 = vsel %vm1206_vm5, %v2863_v29, 0.0 }
 0x2ad   :  { %2065 = vpow2.f32 %v1395_v60  ;;  %v1474_v49 = vsel %vm1206_vm5, %v2865_v59, 0.0 }
 0x2ae   :  { %2067 = vpow2.f32 %v1397_v38  ;;  %1475 = vadd.xlane.f32.xlu1 %v1474_v49  ;;  %1472 = vadd.xlane.f32.xlu0 %v1471_v62 }
 0x2af   :  { %v2871_v58 = vpop.eup %2057 }
 0x2b0   :  { %v2873_v45 = vpop.eup %2059  ;;  %v1477_v1 = vsel %vm1206_vm5, %v2871_v58, 0.0 }
 0x2b1   :  { %v1480_v61 = vsel %vm1206_vm5, %v2873_v45, 0.0 }
 0x2b2   :  { %1481 = vadd.xlane.f32.xlu1 %v1480_v61  ;;  %1478 = vadd.xlane.f32.xlu0 %v1477_v1 }
 0x2b3   :  { %v2879_v4 = vpop.eup %2061 }
 0x2b4   :  { %v2881_v15 = vpop.eup %2063  ;;  %v1483_v5 = vsel %vm1206_vm5, %v2879_v4, 0.0 }
 0x2b5   :  { %v1486_v43 = vsel %vm1206_vm5, %v2881_v15, 0.0 }
 0x2b6   :  { %1487 = vadd.xlane.f32.xlu1 %v1486_v43  ;;  %1484 = vadd.xlane.f32.xlu0 %v1483_v5 }
 0x2b7   :  { %v2887_v13 = vpop.eup %2065 }
 0x2b8   :  { %v2889_v14 = vpop.eup %2067  ;;  %v1489_v27 = vsel %vm1206_vm5, %v2887_v13, 0.0 }
 0x2b9   :  { %v1492_v2 = vsel %vm1206_vm5, %v2889_v14, 0.0 }
 0x2ba   :  { %1493 = vadd.xlane.f32.xlu1 %v1492_v2  ;;  %1490 = vadd.xlane.f32.xlu0 %v1489_v27 }
 0x307   :  { %v1404_v6 = vpop.xlane.xlu1 %1403 }
 0x308   :  { %2069 = vrcp.f32 %v1404_v6 }
 0x30b   :  { %v1401_v22 = vpop.xlane.xlu0 %1400 }
 0x30c   :  { %v1410_v10 = vpop.xlane.xlu1 %1409  ;;  %2071 = vrcp.f32 %v1401_v22 }
 0x30d   :  { %2073 = vrcp.f32 %v1410_v10 }
 0x30f   :  { %v1407_v34 = vpop.xlane.xlu0 %1406 }
 0x310   :  { %2075 = vrcp.f32 %v1407_v34 }
 0x312   :  { %v2070_v19 = vpop.eup %2069 }
 0x313   :  { %v1528_v7 = vmul.f32 %v2070_v19, %v2742_v0  ;;  %v1416_v53 = vpop.xlane.xlu1 %1415  ;;  %v1413_v44 = vpop.xlane.xlu0 %1412 }
 0x314   :  { %2077 = vrcp.f32 %v1416_v53 }
 0x315   :  { %1560 = vst.msk [vmem:[%s3062_s7 + $0x8] sm:$0xff] %vm1206_vm5, %v1528_v7  ;;  %2079 = vrcp.f32 %v1413_v44 }
 0x316   :  { %v2072_v21 = vpop.eup %2071 }
 0x317   :  { %v2074_v51 = vpop.eup %2073  ;;  %v1527_v35 = vmul.f32 %v2072_v21, %v2748_v16  ;;  %v1422_v32 = vpop.xlane.xlu1 %1421 }
 0x318   :  { %v1419_v50 = vpop.xlane.xlu0 %1418  ;;  %v1530_v30 = vmul.f32 %v2074_v51, %v2750_v36  ;;  %2081 = vrcp.f32 %v1422_v32 }
 0x319   :  { %1559 = vst.msk [vmem:[%s3062_s7] sm:$0xff] %vm1206_vm5, %v1527_v35  ;;  %2083 = vrcp.f32 %v1419_v50 }
 0x31a   :  { %v2076_v0 = vpop.eup %2075  ;;  %1562 = vst.msk [vmem:[%s3062_s7 + $0x18] sm:$0xff] %vm1206_vm5, %v1530_v30 }
 0x31b   :  { %v1529_v56 = vmul.f32 %v2076_v0, %v2758_v46  ;;  %v1428_v16 = vpop.xlane.xlu1 %1427 }
 0x31c   :  { %v1425_v33 = vpop.xlane.xlu0 %1424  ;;  %2085 = vrcp.f32 %v1428_v16 }
 0x31d   :  { %1561 = vst.msk [vmem:[%s3062_s7 + $0x10] sm:$0xff] %vm1206_vm5, %v1529_v56  ;;  %2087 = vrcp.f32 %v1425_v33 }
 0x31e   :  { %v2078_v36 = vpop.eup %2077 }
 0x31f   :  { %v2080_v55 = vpop.eup %2079  ;;  %v1532_v25 = vmul.f32 %v2078_v36, %v2766_v37  ;;  %v1434_v41 = vpop.xlane.xlu1 %1433 }
 0x320   :  { %v1431_v12 = vpop.xlane.xlu0 %1430  ;;  %v1531_v24 = vmul.f32 %v2080_v55, %v2762_v54  ;;  %2089 = vrcp.f32 %v1434_v41 }
 0x321   :  { %1564 = vst.msk [vmem:[%s3062_s7 + $0x28] sm:$0xff] %vm1206_vm5, %v1532_v25  ;;  %2091 = vrcp.f32 %v1431_v12 }
 0x322   :  { %v2082_v46 = vpop.eup %2081  ;;  %1563 = vst.msk [vmem:[%s3062_s7 + $0x20] sm:$0xff] %vm1206_vm5, %v1531_v24 }
 0x323   :  { %v2084_v39 = vpop.eup %2083  ;;  %v1534_v37 = vmul.f32 %v2082_v46, %v2776_v63  ;;  %v1440_v60 = vpop.xlane.xlu1 %1439 }
 0x324   :  { %v1437_v38 = vpop.xlane.xlu0 %1436  ;;  %v1533_v54 = vmul.f32 %v2084_v39, %v2772_v31  ;;  %2093 = vrcp.f32 %v1440_v60 }
 0x325   :  { %1566 = vst.msk [vmem:[%s3062_s7 + $0x38] sm:$0xff] %vm1206_vm5, %v1534_v37  ;;  %2095 = vrcp.f32 %v1437_v38 }
 0x326   :  { %v2086_v62 = vpop.eup %2085  ;;  %1565 = vst.msk [vmem:[%s3062_s7 + $0x30] sm:$0xff] %vm1206_vm5, %v1533_v54 }
 0x327   :  { %v2088_v49 = vpop.eup %2087  ;;  %v1536_v63 = vmul.f32 %v2086_v62, %v2785_v47  ;;  %v1446_v1 = vpop.xlane.xlu1 %1445 }
 0x328   :  { %v1443_v61 = vpop.xlane.xlu0 %1442  ;;  %v1535_v31 = vmul.f32 %v2088_v49, %v2782_v8  ;;  %2097 = vrcp.f32 %v1446_v1 }
 0x329   :  { %1568 = vst.msk [vmem:[%s3062_s7 + $0x48] sm:$0xff] %vm1206_vm5, %v1536_v63  ;;  %2099 = vrcp.f32 %v1443_v61 }
 0x32a   :  { %v2090_v5 = vpop.eup %2089  ;;  %1567 = vst.msk [vmem:[%s3062_s7 + $0x40] sm:$0xff] %vm1206_vm5, %v1535_v31 }
 0x32b   :  { %v2092_v43 = vpop.eup %2091  ;;  %v1538_v47 = vmul.f32 %v2090_v5, %v2795_v26  ;;  %v1452_v27 = vpop.xlane.xlu1 %1451 }
 0x32c   :  { %v1449_v2 = vpop.xlane.xlu0 %1448  ;;  %v1537_v8 = vmul.f32 %v2092_v43, %v2792_v18  ;;  %2101 = vrcp.f32 %v1452_v27 }
 0x32d   :  { %1570 = vst.msk [vmem:[%s3062_s7 + $0x58] sm:$0xff] %vm1206_vm5, %v1538_v47  ;;  %2103 = vrcp.f32 %v1449_v2 }
 0x32e   :  { %v2094_v6 = vpop.eup %2093  ;;  %1569 = vst.msk [vmem:[%s3062_s7 + $0x50] sm:$0xff] %vm1206_vm5, %v1537_v8 }
 0x32f   :  { %v2096_v22 = vpop.eup %2095  ;;  %v1540_v26 = vmul.f32 %v2094_v6, %v2805_v48  ;;  %v1458_v10 = vpop.xlane.xlu1 %1457 }
 0x330   :  { %v1455_v34 = vpop.xlane.xlu0 %1454  ;;  %v1539_v18 = vmul.f32 %v2096_v22, %v2802_v17  ;;  %2105 = vrcp.f32 %v1458_v10 }
 0x331   :  { %1572 = vst.msk [vmem:[%s3062_s7 + $0x68] sm:$0xff] %vm1206_vm5, %v1540_v26  ;;  %2107 = vrcp.f32 %v1455_v34 }
 0x332   :  { %v2098_v19 = vpop.eup %2097  ;;  %1571 = vst.msk [vmem:[%s3062_s7 + $0x60] sm:$0xff] %vm1206_vm5, %v1539_v18 }
 0x333   :  { %v2100_v7 = vpop.eup %2099  ;;  %v1542_v48 = vmul.f32 %v2098_v19, %v2815_v57  ;;  %v1464_v53 = vpop.xlane.xlu1 %1463 }
 0x334   :  { %v1461_v44 = vpop.xlane.xlu0 %1460  ;;  %v1541_v17 = vmul.f32 %v2100_v7, %v2812_v11  ;;  %2109 = vrcp.f32 %v1464_v53 }
 0x335   :  { %1574 = vst.msk [vmem:[%s3062_s7 + $0x78] sm:$0xff] %vm1206_vm5, %v1542_v48  ;;  %2111 = vrcp.f32 %v1461_v44 }
 0x336   :  { %v2102_v21 = vpop.eup %2101  ;;  %1573 = vst.msk [vmem:[%s3062_s7 + $0x70] sm:$0xff] %vm1206_vm5, %v1541_v17 }
 0x337   :  { %v2104_v51 = vpop.eup %2103  ;;  %v1544_v57 = vmul.f32 %v2102_v21, %v2825_v3  ;;  %v1470_v35 = vpop.xlane.xlu1 %1469 }
 0x338   :  { %v1467_v32 = vpop.xlane.xlu0 %1466  ;;  %v1543_v11 = vmul.f32 %v2104_v51, %v2823_v42  ;;  %2113 = vrcp.f32 %v1470_v35 }
 0x339   :  { %1576 = vst.msk [vmem:[%s3062_s7 + $0x88] sm:$0xff] %vm1206_vm5, %v1544_v57  ;;  %2115 = vrcp.f32 %v1467_v32 }
 0x33a   :  { %v2106_v50 = vpop.eup %2105  ;;  %1575 = vst.msk [vmem:[%s3062_s7 + $0x80] sm:$0xff] %vm1206_vm5, %v1543_v11 }
 0x33b   :  { %v2108_v30 = vpop.eup %2107  ;;  %v1546_v3 = vmul.f32 %v2106_v50, %v2835_v28  ;;  %v1476_v0 = vpop.xlane.xlu1 %1475 }
 0x33c   :  { %v1473_v56 = vpop.xlane.xlu0 %1472  ;;  %v1545_v42 = vmul.f32 %v2108_v30, %v2833_v9  ;;  %2117 = vrcp.f32 %v1476_v0 }
 0x33d   :  { %1578 = vst.msk [vmem:[%s3062_s7 + $0x98] sm:$0xff] %vm1206_vm5, %v1546_v3  ;;  %2119 = vrcp.f32 %v1473_v56 }
 0x33e   :  { %v2110_v16 = vpop.eup %2109  ;;  %1577 = vst.msk [vmem:[%s3062_s7 + $0x90] sm:$0xff] %vm1206_vm5, %v1545_v42 }
 0x33f   :  { %v2112_v33 = vpop.eup %2111  ;;  %v1548_v28 = vmul.f32 %v2110_v16, %v2845_v40  ;;  %v1482_v36 = vpop.xlane.xlu1 %1481 }
 0x340   :  { %v1479_v55 = vpop.xlane.xlu0 %1478  ;;  %v1547_v9 = vmul.f32 %v2112_v33, %v2843_v20  ;;  %2121 = vrcp.f32 %v1482_v36 }
 0x341   :  { %1580 = vst.msk [vmem:[%s3062_s7 + $0xa8] sm:$0xff] %vm1206_vm5, %v1548_v28  ;;  %2123 = vrcp.f32 %v1479_v55 }
 0x342   :  { %v2114_v25 = vpop.eup %2113  ;;  %1579 = vst.msk [vmem:[%s3062_s7 + $0xa0] sm:$0xff] %vm1206_vm5, %v1547_v9 }
 0x343   :  { %v2116_v41 = vpop.eup %2115  ;;  %v1550_v40 = vmul.f32 %v2114_v25, %v2855_v23  ;;  %v1488_v12 = vpop.xlane.xlu1 %1487 }
 0x344   :  { %v1485_v24 = vpop.xlane.xlu0 %1484  ;;  %v1549_v20 = vmul.f32 %v2116_v41, %v2853_v52  ;;  %2125 = vrcp.f32 %v1488_v12 }
 0x345   :  { %1582 = vst.msk [vmem:[%s3062_s7 + $0xb8] sm:$0xff] %vm1206_vm5, %v1550_v40  ;;  %2127 = vrcp.f32 %v1485_v24 }
 0x346   :  { %v2118_v46 = vpop.eup %2117  ;;  %1581 = vst.msk [vmem:[%s3062_s7 + $0xb0] sm:$0xff] %vm1206_vm5, %v1549_v20 }
 0x347   :  { %v2120_v39 = vpop.eup %2119  ;;  %v1552_v23 = vmul.f32 %v2118_v46, %v2865_v59  ;;  %v1494_v37 = vpop.xlane.xlu1 %1493 }
 0x348   :  { %v1491_v60 = vpop.xlane.xlu0 %1490  ;;  %v1551_v52 = vmul.f32 %v2120_v39, %v2863_v29  ;;  %2129 = vrcp.f32 %v1494_v37 }
 0x349   :  { %1584 = vst.msk [vmem:[%s3062_s7 + $0xc8] sm:$0xff] %vm1206_vm5, %v1552_v23  ;;  %2131 = vrcp.f32 %v1491_v60 }
 0x34a   :  { %v2122_v38 = vpop.eup %2121  ;;  %1583 = vst.msk [vmem:[%s3062_s7 + $0xc0] sm:$0xff] %vm1206_vm5, %v1551_v52 }
 0x34b   :  { %v2124_v54 = vpop.eup %2123  ;;  %v1554_v59 = vmul.f32 %v2122_v38, %v2873_v45 }
 0x34c   :  { %v1553_v62 = vmul.f32 %v2124_v54, %v2871_v58 }
 0x34d   :  { %1586 = vst.msk [vmem:[%s3062_s7 + $0xd8] sm:$0xff] %vm1206_vm5, %v1554_v59 }
 0x34e   :  { %v2126_v29 = vpop.eup %2125  ;;  %1585 = vst.msk [vmem:[%s3062_s7 + $0xd0] sm:$0xff] %vm1206_vm5, %v1553_v62 }
 0x34f   :  { %v2128_v49 = vpop.eup %2127  ;;  %v1556_v63 = vmul.f32 %v2126_v29, %v2881_v15 }
 0x350   :  { %v1555_v1 = vmul.f32 %v2128_v49, %v2879_v4 }
 0x351   :  { %1588 = vst.msk [vmem:[%s3062_s7 + $0xe8] sm:$0xff] %vm1206_vm5, %v1556_v63 }
 0x352   :  { %v2130_v58 = vpop.eup %2129  ;;  %1587 = vst.msk [vmem:[%s3062_s7 + $0xe0] sm:$0xff] %vm1206_vm5, %v1555_v1 }
 0x353   :  { %v2132_v45 = vpop.eup %2131  ;;  %v1558_v61 = vmul.f32 %v2130_v58, %v2889_v14 }
 0x354   :  { %v1557_v31 = vmul.f32 %v2132_v45, %v2887_v13 }
 0x355   :  { %1590 = vst.msk [vmem:[%s3062_s7 + $0xf8] sm:$0xff] %vm1206_vm5, %v1558_v61 }
 0x356   :  { %1589 = vst.msk [vmem:[%s3062_s7 + $0xf0] sm:$0xff] %vm1206_vm5, %v1557_v31 }

</bundles_post_ra>
